<compile_context>
chip_gen: v7x
topology: tpu7x:2x2x1
jax: 0.10.0
libtpu: 0.0.40
codegen_flags: <defaults>
</compile_context>

<pallas_src>
import functools
import math

import jax
import jax.numpy as jnp
from jax.experimental import pallas as pl
from jax.experimental.pallas import tpu as pltpu


def _cdiv(a, b):
    return (a + b - 1) // b


# ---------------------------------------------------------------------------
# Kernel: the full encoder stack.  Grid = (batch_tiles, num_layers).
# The activation block for the current batch tile lives in a VMEM scratch and
# is carried across the inner ("arbitrary") layer axis; per-layer weights are
# streamed in through their BlockSpecs.
# ---------------------------------------------------------------------------
def _encoder_stack_kernel(
    x_ref,      # (BT*S_pad, E)  f32   input activations (batch tile, flattened)
    wqkv_ref,   # (1, E, 3E)     bf16  packed QKV projection (Q pre-scaled)
    bqkv_ref,   # (1, 1, 3E)     f32
    wo_ref,     # (1, E, E)      bf16  attention output projection
    bo_ref,     # (1, 1, E)      f32
    g1_ref,     # (1, 1, E)      f32   LayerNorm1 gamma
    be1_ref,    # (1, 1, E)      f32   LayerNorm1 beta
    w1_ref,     # (1, E, F)      bf16  FFN linear1
    b1_ref,     # (1, 1, F)      f32
    w2_ref,     # (1, F, E)      bf16  FFN linear2
    b2_ref,     # (1, 1, E)      f32
    g2_ref,     # (1, 1, E)      f32   LayerNorm2 gamma
    be2_ref,    # (1, 1, E)      f32   LayerNorm2 beta
    o_ref,      # (BT*S_pad, E)  f32   output activations
    x_scratch,  # (BT*S_pad, E)  f32   VMEM-resident activations across layers
    *,
    b_tile: int,
    seq_len: int,
    seq_pad: int,
    num_heads: int,
    head_dim: int,
    eps: float,
    use_mask: bool,
):
    layer = pl.program_id(1)
    n_layers = pl.num_programs(1)
    E = num_heads * head_dim
    BS = b_tile * seq_pad

    # Layer 0: pull this batch tile into the resident VMEM scratch.
    @pl.when(layer == 0)
    def _():
        x_scratch[...] = x_ref[...]

    x = x_scratch[...]                       # (BS, E) f32
    xb = x.astype(jnp.bfloat16)

    # ---- packed QKV projection (bf16 MXU, f32 accumulate) ------------------
    # 1/sqrt(head_dim) has been folded into the Q columns of wqkv / bqkv.
    qkv = jnp.dot(xb, wqkv_ref[0], preferred_element_type=jnp.float32)
    qkv = qkv + bqkv_ref[0]                  # (BS, 3E) f32
    qkv3 = qkv.reshape(b_tile, seq_pad, 3 * E)

    # ---- in-kernel mask (causal and/or key padding), hoisted out of loop ---
    need_mask = use_mask or (seq_pad > seq_len)
    if need_mask:
        row = jax.lax.broadcasted_iota(jnp.int32, (b_tile, seq_pad, seq_pad), 1)
        col = jax.lax.broadcasted_iota(jnp.int32, (b_tile, seq_pad, seq_pad), 2)
        if use_mask and seq_pad > seq_len:
            allow = (col <= row) & (col < seq_len)
        elif use_mask:
            allow = col <= row
        else:
            allow = col < seq_len

    wo = wo_ref[0]                           # (E, E) bf16

    # ---- multi-head attention: batched over the batch tile per head; each
    # head output folded straight into the output projection (no concat) -----
    attn = jnp.zeros((BS, E), jnp.float32)
    for h in range(num_heads):
        lo, hi = h * head_dim, (h + 1) * head_dim
        qh = qkv3[:, :, lo:hi].astype(jnp.bfloat16)                   # (BT,S,dh)
        kh = qkv3[:, :, E + lo:E + hi].astype(jnp.bfloat16)
        vh = qkv3[:, :, 2 * E + lo:2 * E + hi].astype(jnp.bfloat16)

        s = jnp.einsum('bqd,bkd->bqk', qh, kh,
                       preferred_element_type=jnp.float32)            # (BT,S,S)
        if need_mask:
            s = jnp.where(allow, s, -jnp.inf)
        m = jnp.max(s, axis=-1, keepdims=True)
        p = jnp.exp(s - m)
        denom = jnp.sum(p, axis=-1, keepdims=True)
        p = p * pl.reciprocal(denom, approx=True)

        oh = jnp.einsum('bqk,bkd->bqd', p.astype(jnp.bfloat16), vh,
                        preferred_element_type=jnp.float32)           # (BT,S,dh)
        oh2 = oh.reshape(BS, head_dim).astype(jnp.bfloat16)
        attn = attn + jnp.dot(oh2, wo[lo:hi, :],
                              preferred_element_type=jnp.float32)     # (BS, E)

    # ---- residual + LayerNorm1 (all f32) ------------------------------------
    x1 = x + attn + bo_ref[0]

    def _layer_norm(z, gamma, beta):
        mu = jnp.mean(z, axis=-1, keepdims=True)
        d = z - mu
        var = jnp.mean(d * d, axis=-1, keepdims=True)
        return d * jax.lax.rsqrt(var + eps) * gamma + beta

    x1n = _layer_norm(x1, g1_ref[0], be1_ref[0])

    # ---- feed-forward (bf16 MXU) + residual + LayerNorm2 --------------------
    h1 = jnp.dot(x1n.astype(jnp.bfloat16), w1_ref[0],
                 preferred_element_type=jnp.float32) + b1_ref[0]
    h1 = jnp.maximum(h1, 0.0)
    ff = jnp.dot(h1.astype(jnp.bfloat16), w2_ref[0],
                 preferred_element_type=jnp.float32) + b2_ref[0]

    y = _layer_norm(x1n + ff, g2_ref[0], be2_ref[0])

    # carry to the next layer; emit on the last layer
    x_scratch[...] = y

    @pl.when(layer == n_layers - 1)
    def _():
        o_ref[...] = y


# ---------------------------------------------------------------------------
# Wrapper: a single pallas_call for the whole encoder stack.
# ---------------------------------------------------------------------------
def transformer_model_forward(src, layer_params, num_heads, use_mask=True,
                              b_tile=None):
    """Forward pass of TransformerModel.

    src: (S, N, E) float32 -- same convention as PyTorch batch_first=False.
    layer_params: list (length num_layers) of per-layer parameter dicts.
    """
    S, N, E = src.shape
    assert E % num_heads == 0
    head_dim = E // num_heads
    L = len(layer_params)
    F = layer_params[0]["w1"].shape[1]

    # --- batch / sequence tiling ---------------------------------------------
    if b_tile is None:
        b_tile = min(8, N)
        # keep >= 2 parallel grid steps when possible (two v7x TensorCores)
        if N >= 2 and _cdiv(N, b_tile) < 2:
            b_tile = _cdiv(N, 2)
    n_tiles = _cdiv(N, b_tile)
    n_pad = n_tiles * b_tile
    s_pad = _cdiv(S, 8) * 8               # sublane-aligned sequence length

    # --- stack per-layer params, fold Q scale, cast matmul weights to bf16 ---
    def stack(name):
        return jnp.stack([p[name] for p in layer_params])

    scale = 1.0 / math.sqrt(head_dim)
    qscale = jnp.concatenate(
        [jnp.full((E,), scale, jnp.float32), jnp.ones((2 * E,), jnp.float32)])

    wqkv = (stack("wqkv") * qscale[None, None, :]).astype(jnp.bfloat16)
    bqkv = stack("bqkv") * qscale[None, None, :]
    wo = stack("wo").astype(jnp.bfloat16)
    bo = stack("bo")
    g1, be1 = stack("ln1_g"), stack("ln1_b")
    w1 = stack("w1").astype(jnp.bfloat16)
    b1 = stack("b1")
    w2 = stack("w2").astype(jnp.bfloat16)
    b2 = stack("b2")
    g2, be2 = stack("ln2_g"), stack("ln2_b")

    # --- activations: batch-major, flattened to (N_pad*S_pad, E) -------------
    # One transpose at entry/exit of the whole fused stack (not per layer).
    x = jnp.transpose(src, (1, 0, 2))
    x = jnp.pad(x, ((0, n_pad - N), (0, s_pad - S), (0, 0)))
    x = x.reshape(n_pad * s_pad, E).astype(jnp.float32)

    blk = b_tile * s_pad
    weights = [wqkv, bqkv, wo, bo, g1, be1, w1, b1, w2, b2, g2, be2]

    def wspec(arr):
        return pl.BlockSpec((1,) + arr.shape[1:], lambda b, l: (l, 0, 0))

    kernel = functools.partial(
        _encoder_stack_kernel,
        b_tile=b_tile, seq_len=S, seq_pad=s_pad,
        num_heads=num_heads, head_dim=head_dim,
        eps=1e-5, use_mask=use_mask)

    # VMEM budget: double-buffered weight blocks + resident activation block
    # + in-flight temporaries (qkv, FFN hidden, per-head scores).
    w_bytes = 2 * (E * 3 * E + E * E + 2 * E * F)             # bf16 weights/layer
    bias_bytes = 4 * (3 * E + 6 * E + F)
    act_bytes = 4 * blk * E
    tmp_bytes = 4 * blk * (3 * E + F) + 8 * b_tile * s_pad * s_pad
    est = 2 * (w_bytes + bias_bytes) + 4 * act_bytes + tmp_bytes
    vmem_limit = int(min(96 * 2 ** 20, max(32 * 2 ** 20, 2 * est)))

    out = pl.pallas_call(
        kernel,
        grid=(n_tiles, L),
        in_specs=[pl.BlockSpec((blk, E), lambda b, l: (b, 0))]
                 + [wspec(w) for w in weights],
        out_specs=pl.BlockSpec((blk, E), lambda b, l: (b, 0)),
        out_shape=jax.ShapeDtypeStruct((n_pad * s_pad, E), jnp.float32),
        scratch_shapes=[pltpu.VMEM((blk, E), jnp.float32)],
        compiler_params=pltpu.CompilerParams(
            dimension_semantics=("parallel", "arbitrary"),
            vmem_limit_bytes=vmem_limit),
    )(x, *weights)

    y = out.reshape(n_pad, s_pad, E)[:N, :S]
    return jnp.transpose(y, (1, 0, 2))      # back to (S, N, E)


# ---------------------------------------------------------------------------
# Deterministic synthetic parameter initialization (f32, PyTorch-like layout:
# stored transposed so the kernel computes x @ W).
# ---------------------------------------------------------------------------
def init_params(key, num_layers, embed_dim, fc_size):
    E, F = embed_dim, fc_size
    layers = []
    for _ in range(num_layers):
        key, k_qkv, k_o, k_1, k_2 = jax.random.split(key, 5)
        layers.append({
            "wqkv": (jax.random.normal(k_qkv, (E, 3 * E), jnp.float32)
                     * (1.0 / math.sqrt(E))),
            "bqkv": jnp.zeros((1, 3 * E), jnp.float32),
            "wo": (jax.random.normal(k_o, (E, E), jnp.float32)
                   * (1.0 / math.sqrt(E))),
            "bo": jnp.zeros((1, E), jnp.float32),
            "ln1_g": jnp.ones((1, E), jnp.float32),
            "ln1_b": jnp.zeros((1, E), jnp.float32),
            "w1": (jax.random.normal(k_1, (E, F), jnp.float32)
                   * (1.0 / math.sqrt(E))),
            "b1": jnp.zeros((1, F), jnp.float32),
            "w2": (jax.random.normal(k_2, (F, E), jnp.float32)
                   * (1.0 / math.sqrt(F))),
            "b2": jnp.zeros((1, E), jnp.float32),
            "ln2_g": jnp.ones((1, E), jnp.float32),
            "ln2_b": jnp.zeros((1, E), jnp.float32),
        })
    return layers


if __name__ == "__main__":
    # Small config consistent with TransformerModel(embed_dim, num_heads,
    # fc_size, num_layers); dropout=0 in the reference module.
    embed_dim, num_heads, fc_size, num_layers = 32, 4, 64, 2
    seq_len, batch = 8, 2

    key = jax.random.PRNGKey(0)
    key, k_src = jax.random.split(key)
    src = jax.random.normal(k_src, (seq_len, batch, embed_dim), jnp.float32)

    params = init_params(key, num_layers, embed_dim, fc_size)

    out = transformer_model_forward(src, params, num_heads, use_mask=True)
    out = jax.block_until_ready(out)

    assert out.shape == (seq_len, batch, embed_dim)
    assert bool(jnp.all(jnp.isfinite(out)))
    print("KERNEL_OK")
</pallas_src>

<mosaic_0001>
module attributes {stable_mosaic.version = 11 : i64} {
  func.func @_encoder_stack_kernel(%arg0: i32, %arg1: i32, %arg2: memref<8x32xf32, #tpu.memory_space<vmem>>, %arg3: memref<1x32x96xbf16, #tpu.memory_space<vmem>>, %arg4: memref<1x1x96xf32, #tpu.memory_space<vmem>>, %arg5: memref<1x32x32xbf16, #tpu.memory_space<vmem>>, %arg6: memref<1x1x32xf32, #tpu.memory_space<vmem>>, %arg7: memref<1x1x32xf32, #tpu.memory_space<vmem>>, %arg8: memref<1x1x32xf32, #tpu.memory_space<vmem>>, %arg9: memref<1x32x64xbf16, #tpu.memory_space<vmem>>, %arg10: memref<1x1x64xf32, #tpu.memory_space<vmem>>, %arg11: memref<1x64x32xbf16, #tpu.memory_space<vmem>>, %arg12: memref<1x1x32xf32, #tpu.memory_space<vmem>>, %arg13: memref<1x1x32xf32, #tpu.memory_space<vmem>>, %arg14: memref<1x1x32xf32, #tpu.memory_space<vmem>>, %arg15: memref<8x32xf32, #tpu.memory_space<vmem>>, %arg16: memref<8x32xf32, #tpu.memory_space<vmem>>) attributes {dimension_semantics = [#tpu.dimension_semantics<parallel>, #tpu.dimension_semantics<arbitrary>], iteration_bounds = array<i64: 2, 2>, scalar_prefetch = 0 : i64, scratch_operands = 1 : i64, tpu.core_type = #tpu.core_type<tc>, window_params = [{transform_indices = @transform_0, window_bounds = array<i64: 8, 32>}, {transform_indices = @transform_1, window_bounds = array<i64: 1, 32, 96>}, {transform_indices = @transform_2, window_bounds = array<i64: 1, 1, 96>}, {transform_indices = @transform_3, window_bounds = array<i64: 1, 32, 32>}, {transform_indices = @transform_4, window_bounds = array<i64: 1, 1, 32>}, {transform_indices = @transform_5, window_bounds = array<i64: 1, 1, 32>}, {transform_indices = @transform_6, window_bounds = array<i64: 1, 1, 32>}, {transform_indices = @transform_7, window_bounds = array<i64: 1, 32, 64>}, {transform_indices = @transform_8, window_bounds = array<i64: 1, 1, 64>}, {transform_indices = @transform_9, window_bounds = array<i64: 1, 64, 32>}, {transform_indices = @transform_10, window_bounds = array<i64: 1, 1, 32>}, {transform_indices = @transform_11, window_bounds = array<i64: 1, 1, 32>}, {transform_indices = @transform_12, window_bounds = array<i64: 1, 1, 32>}, {transform_indices = @transform_13, window_bounds = array<i64: 8, 32>}]} {
    %c0_i32 = arith.constant 0 : i32
    %0 = arith.cmpi eq, %arg1, %c0_i32 : i32
    %1 = arith.extui %0 : i1 to i32
    %c0_i32_0 = arith.constant 0 : i32
    %2 = arith.cmpi ne, %1, %c0_i32_0 : i32
    scf.if %2 {
      %c0_79 = arith.constant 0 : index
      %c0_80 = arith.constant 0 : index
      %199 = vector.load %arg2[%c0_79, %c0_80] : memref<8x32xf32, #tpu.memory_space<vmem>>, vector<8x32xf32>
      %c0_81 = arith.constant 0 : index
      %c0_82 = arith.constant 0 : index
      %200 = vector.load %arg16[%c0_81, %c0_82] : memref<8x32xf32, #tpu.memory_space<vmem>>, vector<8x32xf32>
      tpu.vector_store %arg16[%c0_81, %c0_82], %199 {strides = array<i32>} : memref<8x32xf32, #tpu.memory_space<vmem>>, vector<8x32xf32>,
    } else {
    }
    %c0 = arith.constant 0 : index
    %c0_1 = arith.constant 0 : index
    %3 = vector.load %arg16[%c0, %c0_1] : memref<8x32xf32, #tpu.memory_space<vmem>>, vector<8x32xf32>
    %4 = arith.truncf %3 : vector<8x32xf32> to vector<8x32xbf16>
    %c0_2 = arith.constant 0 : index
    %c0_3 = arith.constant 0 : index
    %c0_4 = arith.constant 0 : index
    %5 = vector.load %arg3[%c0_2, %c0_3, %c0_4] : memref<1x32x96xbf16, #tpu.memory_space<vmem>>, vector<1x32x96xbf16>
    %6 = vector.shape_cast %5 : vector<1x32x96xbf16> to vector<32x96xbf16>
    %cst = arith.constant dense<0.000000e+00> : vector<8x96xf32>
    %7 = tpu.matmul %4, %6, %cst {dimension_numbers = #tpu.dot_dimension_numbers<[1], [0], [0], [1], [0, 0, 1, 1], [], []>} : vector<8x32xbf16>, vector<32x96xbf16>, vector<8x96xf32> -> vector<8x96xf32>
    %c0_5 = arith.constant 0 : index
    %c0_6 = arith.constant 0 : index
    %c0_7 = arith.constant 0 : index
    %8 = vector.load %arg4[%c0_5, %c0_6, %c0_7] : memref<1x1x96xf32, #tpu.memory_space<vmem>>, vector<1x1x96xf32>
    %9 = vector.shape_cast %8 : vector<1x1x96xf32> to vector<1x96xf32>
    %10 = vector.broadcast %9 : vector<1x96xf32> to vector<8x96xf32>
    %11 = arith.addf %7, %10 : vector<8x96xf32>
    %12 = vector.shape_cast %11 : vector<8x96xf32> to vector<1x8x96xf32>
    %13 = tpu.iota {dimensions = array<i32: 1>} : vector<1x8x8xi32>
    %14 = tpu.iota {dimensions = array<i32: 2>} : vector<1x8x8xi32>
    %15 = arith.cmpi sle, %14, %13 : vector<1x8x8xi32>
    %c0_8 = arith.constant 0 : index
    %c0_9 = arith.constant 0 : index
    %c0_10 = arith.constant 0 : index
    %16 = vector.load %arg5[%c0_8, %c0_9, %c0_10] : memref<1x32x32xbf16, #tpu.memory_space<vmem>>, vector<1x32x32xbf16>
    %17 = vector.shape_cast %16 : vector<1x32x32xbf16> to vector<32x32xbf16>
    %cst_11 = arith.constant 0.000000e+00 : f32
    %18 = vector.broadcast %cst_11 : f32 to vector<8x32xf32>
    %19 = vector.extract_strided_slice %12 {offsets = [0, 0, 0], sizes = [1, 8, 8], strides = [1, 1, 1]} : vector<1x8x96xf32> to vector<1x8x8xf32>
    %20 = arith.truncf %19 : vector<1x8x8xf32> to vector<1x8x8xbf16>
    %21 = vector.extract_strided_slice %12 {offsets = [0, 0, 32], sizes = [1, 8, 8], strides = [1, 1, 1]} : vector<1x8x96xf32> to vector<1x8x8xf32>
    %22 = arith.truncf %21 : vector<1x8x8xf32> to vector<1x8x8xbf16>
    %23 = vector.extract_strided_slice %12 {offsets = [0, 0, 64], sizes = [1, 8, 8], strides = [1, 1, 1]} : vector<1x8x96xf32> to vector<1x8x8xf32>
    %24 = arith.truncf %23 : vector<1x8x8xf32> to vector<1x8x8xbf16>
    "tpu.trace_start"() <{level = 10 : i32, message = "bqd,bkd->bqk"}> : () -> ()
    %cst_12 = arith.constant dense<0.000000e+00> : vector<1x8x8xf32>
    %25 = tpu.matmul %20, %22, %cst_12 {dimension_numbers = #tpu.dot_dimension_numbers<[2], [2], [1], [1], [0, 0, 0, 1, 1, 1], [0], [0]>} : vector<1x8x8xbf16>, vector<1x8x8xbf16>, vector<1x8x8xf32> -> vector<1x8x8xf32>
    %cst_13 = arith.constant 0xFF800000 : f32
    "tpu.trace_stop"() : () -> ()
    %26 = vector.broadcast %cst_13 : f32 to vector<1x8x8xf32>
    %27 = arith.select %15, %25, %26 : vector<1x8x8xi1>, vector<1x8x8xf32>
    %cst_14 = arith.constant dense<0xFF800000> : vector<1x8xf32>
    %28 = vector.multi_reduction <maximumf>, %27, %cst_14 [2] : vector<1x8x8xf32> to vector<1x8xf32>
    %29 = vector.shape_cast %28 : vector<1x8xf32> to vector<1x8x1xf32>
    %30 = vector.broadcast %29 : vector<1x8x1xf32> to vector<1x8x8xf32>
    %31 = arith.subf %27, %30 : vector<1x8x8xf32>
    %32 = math.exp %31 : vector<1x8x8xf32>
    %cst_15 = arith.constant dense<0.000000e+00> : vector<1x8xf32>
    %33 = vector.multi_reduction <add>, %32, %cst_15 [2] : vector<1x8x8xf32> to vector<1x8xf32>
    %34 = vector.shape_cast %33 : vector<1x8xf32> to vector<1x8x1xf32>
    %35 = tpu.reciprocal %34 {approx = true} : vector<1x8x1xf32> -> vector<1x8x1xf32>
    %36 = vector.broadcast %35 : vector<1x8x1xf32> to vector<1x8x8xf32>
    %37 = arith.mulf %32, %36 : vector<1x8x8xf32>
    %38 = arith.truncf %37 : vector<1x8x8xf32> to vector<1x8x8xbf16>
    "tpu.trace_start"() <{level = 10 : i32, message = "bqk,bkd->bqd"}> : () -> ()
    %cst_16 = arith.constant dense<0.000000e+00> : vector<1x8x8xf32>
    %39 = tpu.matmul %38, %24, %cst_16 {dimension_numbers = #tpu.dot_dimension_numbers<[2], [1], [1], [2], [0, 0, 0, 1, 1, 2], [0], [0]>} : vector<1x8x8xbf16>, vector<1x8x8xbf16>, vector<1x8x8xf32> -> vector<1x8x8xf32>
    "tpu.trace_stop"() : () -> ()
    %40 = vector.shape_cast %39 : vector<1x8x8xf32> to vector<8x8xf32>
    %41 = arith.truncf %40 : vector<8x8xf32> to vector<8x8xbf16>
    %42 = vector.extract_strided_slice %17 {offsets = [0, 0], sizes = [8, 32], strides = [1, 1]} : vector<32x32xbf16> to vector<8x32xbf16>
    %cst_17 = arith.constant dense<0.000000e+00> : vector<8x32xf32>
    %43 = tpu.matmul %41, %42, %cst_17 {dimension_numbers = #tpu.dot_dimension_numbers<[1], [0], [0], [1], [0, 0, 1, 1], [], []>} : vector<8x8xbf16>, vector<8x32xbf16>, vector<8x32xf32> -> vector<8x32xf32>
    %44 = arith.addf %18, %43 : vector<8x32xf32>
    %45 = vector.extract_strided_slice %12 {offsets = [0, 0, 8], sizes = [1, 8, 8], strides = [1, 1, 1]} : vector<1x8x96xf32> to vector<1x8x8xf32>
    %46 = arith.truncf %45 : vector<1x8x8xf32> to vector<1x8x8xbf16>
    %47 = vector.extract_strided_slice %12 {offsets = [0, 0, 40], sizes = [1, 8, 8], strides = [1, 1, 1]} : vector<1x8x96xf32> to vector<1x8x8xf32>
    %48 = arith.truncf %47 : vector<1x8x8xf32> to vector<1x8x8xbf16>
    %49 = vector.extract_strided_slice %12 {offsets = [0, 0, 72], sizes = [1, 8, 8], strides = [1, 1, 1]} : vector<1x8x96xf32> to vector<1x8x8xf32>
    %50 = arith.truncf %49 : vector<1x8x8xf32> to vector<1x8x8xbf16>
    "tpu.trace_start"() <{level = 10 : i32, message = "bqd,bkd->bqk"}> : () -> ()
    %cst_18 = arith.constant dense<0.000000e+00> : vector<1x8x8xf32>
    %51 = tpu.matmul %46, %48, %cst_18 {dimension_numbers = #tpu.dot_dimension_numbers<[2], [2], [1], [1], [0, 0, 0, 1, 1, 1], [0], [0]>} : vector<1x8x8xbf16>, vector<1x8x8xbf16>, vector<1x8x8xf32> -> vector<1x8x8xf32>
    %cst_19 = arith.constant 0xFF800000 : f32
    "tpu.trace_stop"() : () -> ()
    %52 = vector.broadcast %cst_19 : f32 to vector<1x8x8xf32>
    %53 = arith.select %15, %51, %52 : vector<1x8x8xi1>, vector<1x8x8xf32>
    %cst_20 = arith.constant dense<0xFF800000> : vector<1x8xf32>
    %54 = vector.multi_reduction <maximumf>, %53, %cst_20 [2] : vector<1x8x8xf32> to vector<1x8xf32>
    %55 = vector.shape_cast %54 : vector<1x8xf32> to vector<1x8x1xf32>
    %56 = vector.broadcast %55 : vector<1x8x1xf32> to vector<1x8x8xf32>
    %57 = arith.subf %53, %56 : vector<1x8x8xf32>
    %58 = math.exp %57 : vector<1x8x8xf32>
    %cst_21 = arith.constant dense<0.000000e+00> : vector<1x8xf32>
    %59 = vector.multi_reduction <add>, %58, %cst_21 [2] : vector<1x8x8xf32> to vector<1x8xf32>
    %60 = vector.shape_cast %59 : vector<1x8xf32> to vector<1x8x1xf32>
    %61 = tpu.reciprocal %60 {approx = true} : vector<1x8x1xf32> -> vector<1x8x1xf32>
    %62 = vector.broadcast %61 : vector<1x8x1xf32> to vector<1x8x8xf32>
    %63 = arith.mulf %58, %62 : vector<1x8x8xf32>
    %64 = arith.truncf %63 : vector<1x8x8xf32> to vector<1x8x8xbf16>
    "tpu.trace_start"() <{level = 10 : i32, message = "bqk,bkd->bqd"}> : () -> ()
    %cst_22 = arith.constant dense<0.000000e+00> : vector<1x8x8xf32>
    %65 = tpu.matmul %64, %50, %cst_22 {dimension_numbers = #tpu.dot_dimension_numbers<[2], [1], [1], [2], [0, 0, 0, 1, 1, 2], [0], [0]>} : vector<1x8x8xbf16>, vector<1x8x8xbf16>, vector<1x8x8xf32> -> vector<1x8x8xf32>
    "tpu.trace_stop"() : () -> ()
    %66 = vector.shape_cast %65 : vector<1x8x8xf32> to vector<8x8xf32>
    %67 = arith.truncf %66 : vector<8x8xf32> to vector<8x8xbf16>
    %68 = vector.extract_strided_slice %17 {offsets = [8, 0], sizes = [8, 32], strides = [1, 1]} : vector<32x32xbf16> to vector<8x32xbf16>
    %cst_23 = arith.constant dense<0.000000e+00> : vector<8x32xf32>
    %69 = tpu.matmul %67, %68, %cst_23 {dimension_numbers = #tpu.dot_dimension_numbers<[1], [0], [0], [1], [0, 0, 1, 1], [], []>} : vector<8x8xbf16>, vector<8x32xbf16>, vector<8x32xf32> -> vector<8x32xf32>
    %70 = arith.addf %44, %69 : vector<8x32xf32>
    %71 = vector.extract_strided_slice %12 {offsets = [0, 0, 16], sizes = [1, 8, 8], strides = [1, 1, 1]} : vector<1x8x96xf32> to vector<1x8x8xf32>
    %72 = arith.truncf %71 : vector<1x8x8xf32> to vector<1x8x8xbf16>
    %73 = vector.extract_strided_slice %12 {offsets = [0, 0, 48], sizes = [1, 8, 8], strides = [1, 1, 1]} : vector<1x8x96xf32> to vector<1x8x8xf32>
    %74 = arith.truncf %73 : vector<1x8x8xf32> to vector<1x8x8xbf16>
    %75 = vector.extract_strided_slice %12 {offsets = [0, 0, 80], sizes = [1, 8, 8], strides = [1, 1, 1]} : vector<1x8x96xf32> to vector<1x8x8xf32>
    %76 = arith.truncf %75 : vector<1x8x8xf32> to vector<1x8x8xbf16>
    "tpu.trace_start"() <{level = 10 : i32, message = "bqd,bkd->bqk"}> : () -> ()
    %cst_24 = arith.constant dense<0.000000e+00> : vector<1x8x8xf32>
    %77 = tpu.matmul %72, %74, %cst_24 {dimension_numbers = #tpu.dot_dimension_numbers<[2], [2], [1], [1], [0, 0, 0, 1, 1, 1], [0], [0]>} : vector<1x8x8xbf16>, vector<1x8x8xbf16>, vector<1x8x8xf32> -> vector<1x8x8xf32>
    %cst_25 = arith.constant 0xFF800000 : f32
    "tpu.trace_stop"() : () -> ()
    %78 = vector.broadcast %cst_25 : f32 to vector<1x8x8xf32>
    %79 = arith.select %15, %77, %78 : vector<1x8x8xi1>, vector<1x8x8xf32>
    %cst_26 = arith.constant dense<0xFF800000> : vector<1x8xf32>
    %80 = vector.multi_reduction <maximumf>, %79, %cst_26 [2] : vector<1x8x8xf32> to vector<1x8xf32>
    %81 = vector.shape_cast %80 : vector<1x8xf32> to vector<1x8x1xf32>
    %82 = vector.broadcast %81 : vector<1x8x1xf32> to vector<1x8x8xf32>
    %83 = arith.subf %79, %82 : vector<1x8x8xf32>
    %84 = math.exp %83 : vector<1x8x8xf32>
    %cst_27 = arith.constant dense<0.000000e+00> : vector<1x8xf32>
    %85 = vector.multi_reduction <add>, %84, %cst_27 [2] : vector<1x8x8xf32> to vector<1x8xf32>
    %86 = vector.shape_cast %85 : vector<1x8xf32> to vector<1x8x1xf32>
    %87 = tpu.reciprocal %86 {approx = true} : vector<1x8x1xf32> -> vector<1x8x1xf32>
    %88 = vector.broadcast %87 : vector<1x8x1xf32> to vector<1x8x8xf32>
    %89 = arith.mulf %84, %88 : vector<1x8x8xf32>
    %90 = arith.truncf %89 : vector<1x8x8xf32> to vector<1x8x8xbf16>
    "tpu.trace_start"() <{level = 10 : i32, message = "bqk,bkd->bqd"}> : () -> ()
    %cst_28 = arith.constant dense<0.000000e+00> : vector<1x8x8xf32>
    %91 = tpu.matmul %90, %76, %cst_28 {dimension_numbers = #tpu.dot_dimension_numbers<[2], [1], [1], [2], [0, 0, 0, 1, 1, 2], [0], [0]>} : vector<1x8x8xbf16>, vector<1x8x8xbf16>, vector<1x8x8xf32> -> vector<1x8x8xf32>
    "tpu.trace_stop"() : () -> ()
    %92 = vector.shape_cast %91 : vector<1x8x8xf32> to vector<8x8xf32>
    %93 = arith.truncf %92 : vector<8x8xf32> to vector<8x8xbf16>
    %94 = vector.extract_strided_slice %17 {offsets = [16, 0], sizes = [8, 32], strides = [1, 1]} : vector<32x32xbf16> to vector<8x32xbf16>
    %cst_29 = arith.constant dense<0.000000e+00> : vector<8x32xf32>
    %95 = tpu.matmul %93, %94, %cst_29 {dimension_numbers = #tpu.dot_dimension_numbers<[1], [0], [0], [1], [0, 0, 1, 1], [], []>} : vector<8x8xbf16>, vector<8x32xbf16>, vector<8x32xf32> -> vector<8x32xf32>
    %96 = arith.addf %70, %95 : vector<8x32xf32>
    %97 = vector.extract_strided_slice %12 {offsets = [0, 0, 24], sizes = [1, 8, 8], strides = [1, 1, 1]} : vector<1x8x96xf32> to vector<1x8x8xf32>
    %98 = arith.truncf %97 : vector<1x8x8xf32> to vector<1x8x8xbf16>
    %99 = vector.extract_strided_slice %12 {offsets = [0, 0, 56], sizes = [1, 8, 8], strides = [1, 1, 1]} : vector<1x8x96xf32> to vector<1x8x8xf32>
    %100 = arith.truncf %99 : vector<1x8x8xf32> to vector<1x8x8xbf16>
    %101 = vector.extract_strided_slice %12 {offsets = [0, 0, 88], sizes = [1, 8, 8], strides = [1, 1, 1]} : vector<1x8x96xf32> to vector<1x8x8xf32>
    %102 = arith.truncf %101 : vector<1x8x8xf32> to vector<1x8x8xbf16>
    "tpu.trace_start"() <{level = 10 : i32, message = "bqd,bkd->bqk"}> : () -> ()
    %cst_30 = arith.constant dense<0.000000e+00> : vector<1x8x8xf32>
    %103 = tpu.matmul %98, %100, %cst_30 {dimension_numbers = #tpu.dot_dimension_numbers<[2], [2], [1], [1], [0, 0, 0, 1, 1, 1], [0], [0]>} : vector<1x8x8xbf16>, vector<1x8x8xbf16>, vector<1x8x8xf32> -> vector<1x8x8xf32>
    %cst_31 = arith.constant 0xFF800000 : f32
    "tpu.trace_stop"() : () -> ()
    %104 = vector.broadcast %cst_31 : f32 to vector<1x8x8xf32>
    %105 = arith.select %15, %103, %104 : vector<1x8x8xi1>, vector<1x8x8xf32>
    %cst_32 = arith.constant dense<0xFF800000> : vector<1x8xf32>
    %106 = vector.multi_reduction <maximumf>, %105, %cst_32 [2] : vector<1x8x8xf32> to vector<1x8xf32>
    %107 = vector.shape_cast %106 : vector<1x8xf32> to vector<1x8x1xf32>
    %108 = vector.broadcast %107 : vector<1x8x1xf32> to vector<1x8x8xf32>
    %109 = arith.subf %105, %108 : vector<1x8x8xf32>
    %110 = math.exp %109 : vector<1x8x8xf32>
    %cst_33 = arith.constant dense<0.000000e+00> : vector<1x8xf32>
    %111 = vector.multi_reduction <add>, %110, %cst_33 [2] : vector<1x8x8xf32> to vector<1x8xf32>
    %112 = vector.shape_cast %111 : vector<1x8xf32> to vector<1x8x1xf32>
    %113 = tpu.reciprocal %112 {approx = true} : vector<1x8x1xf32> -> vector<1x8x1xf32>
    %114 = vector.broadcast %113 : vector<1x8x1xf32> to vector<1x8x8xf32>
    %115 = arith.mulf %110, %114 : vector<1x8x8xf32>
    %116 = arith.truncf %115 : vector<1x8x8xf32> to vector<1x8x8xbf16>
    "tpu.trace_start"() <{level = 10 : i32, message = "bqk,bkd->bqd"}> : () -> ()
    %cst_34 = arith.constant dense<0.000000e+00> : vector<1x8x8xf32>
    %117 = tpu.matmul %116, %102, %cst_34 {dimension_numbers = #tpu.dot_dimension_numbers<[2], [1], [1], [2], [0, 0, 0, 1, 1, 2], [0], [0]>} : vector<1x8x8xbf16>, vector<1x8x8xbf16>, vector<1x8x8xf32> -> vector<1x8x8xf32>
    "tpu.trace_stop"() : () -> ()
    %118 = vector.shape_cast %117 : vector<1x8x8xf32> to vector<8x8xf32>
    %119 = arith.truncf %118 : vector<8x8xf32> to vector<8x8xbf16>
    %120 = vector.extract_strided_slice %17 {offsets = [24, 0], sizes = [8, 32], strides = [1, 1]} : vector<32x32xbf16> to vector<8x32xbf16>
    %cst_35 = arith.constant dense<0.000000e+00> : vector<8x32xf32>
    %121 = tpu.matmul %119, %120, %cst_35 {dimension_numbers = #tpu.dot_dimension_numbers<[1], [0], [0], [1], [0, 0, 1, 1], [], []>} : vector<8x8xbf16>, vector<8x32xbf16>, vector<8x32xf32> -> vector<8x32xf32>
    %122 = arith.addf %96, %121 : vector<8x32xf32>
    %123 = arith.addf %3, %122 : vector<8x32xf32>
    %c0_36 = arith.constant 0 : index
    %c0_37 = arith.constant 0 : index
    %c0_38 = arith.constant 0 : index
    %124 = vector.load %arg6[%c0_36, %c0_37, %c0_38] : memref<1x1x32xf32, #tpu.memory_space<vmem>>, vector<1x1x32xf32>
    %125 = vector.shape_cast %124 : vector<1x1x32xf32> to vector<1x32xf32>
    %126 = vector.broadcast %125 : vector<1x32xf32> to vector<8x32xf32>
    %127 = arith.addf %123, %126 : vector<8x32xf32>
    %c0_39 = arith.constant 0 : index
    %c0_40 = arith.constant 0 : index
    %c0_41 = arith.constant 0 : index
    %128 = vector.load %arg7[%c0_39, %c0_40, %c0_41] : memref<1x1x32xf32, #tpu.memory_space<vmem>>, vector<1x1x32xf32>
    %129 = vector.shape_cast %128 : vector<1x1x32xf32> to vector<1x32xf32>
    %c0_42 = arith.constant 0 : index
    %c0_43 = arith.constant 0 : index
    %c0_44 = arith.constant 0 : index
    %130 = vector.load %arg8[%c0_42, %c0_43, %c0_44] : memref<1x1x32xf32, #tpu.memory_space<vmem>>, vector<1x1x32xf32>
    %131 = vector.shape_cast %130 : vector<1x1x32xf32> to vector<1x32xf32>
    %cst_45 = arith.constant dense<0.000000e+00> : vector<8xf32>
    %132 = vector.multi_reduction <add>, %127, %cst_45 [1] : vector<8x32xf32> to vector<8xf32>
    %133 = vector.shape_cast %132 : vector<8xf32> to vector<8x1xf32>
    %cst_46 = arith.constant 3.200000e+01 : f32
    %134 = vector.broadcast %cst_46 : f32 to vector<8x1xf32>
    %135 = arith.divf %133, %134 : vector<8x1xf32>
    %136 = vector.broadcast %135 : vector<8x1xf32> to vector<8x32xf32>
    %137 = arith.subf %127, %136 : vector<8x32xf32>
    %138 = arith.mulf %137, %137 : vector<8x32xf32>
    %cst_47 = arith.constant dense<0.000000e+00> : vector<8xf32>
    %139 = vector.multi_reduction <add>, %138, %cst_47 [1] : vector<8x32xf32> to vector<8xf32>
    %140 = vector.shape_cast %139 : vector<8xf32> to vector<8x1xf32>
    %cst_48 = arith.constant 3.200000e+01 : f32
    %141 = vector.broadcast %cst_48 : f32 to vector<8x1xf32>
    %142 = arith.divf %140, %141 : vector<8x1xf32>
    %cst_49 = arith.constant 9.99999974E-6 : f32
    %143 = vector.broadcast %cst_49 : f32 to vector<8x1xf32>
    %144 = arith.addf %142, %143 : vector<8x1xf32>
    %145 = math.rsqrt %144 : vector<8x1xf32>
    %146 = vector.broadcast %145 : vector<8x1xf32> to vector<8x32xf32>
    %147 = arith.mulf %137, %146 : vector<8x32xf32>
    %148 = vector.broadcast %129 : vector<1x32xf32> to vector<8x32xf32>
    %149 = arith.mulf %147, %148 : vector<8x32xf32>
    %150 = vector.broadcast %131 : vector<1x32xf32> to vector<8x32xf32>
    %151 = arith.addf %149, %150 : vector<8x32xf32>
    %152 = arith.truncf %151 : vector<8x32xf32> to vector<8x32xbf16>
    %c0_50 = arith.constant 0 : index
    %c0_51 = arith.constant 0 : index
    %c0_52 = arith.constant 0 : index
    %153 = vector.load %arg9[%c0_50, %c0_51, %c0_52] : memref<1x32x64xbf16, #tpu.memory_space<vmem>>, vector<1x32x64xbf16>
    %154 = vector.shape_cast %153 : vector<1x32x64xbf16> to vector<32x64xbf16>
    %cst_53 = arith.constant dense<0.000000e+00> : vector<8x64xf32>
    %155 = tpu.matmul %152, %154, %cst_53 {dimension_numbers = #tpu.dot_dimension_numbers<[1], [0], [0], [1], [0, 0, 1, 1], [], []>} : vector<8x32xbf16>, vector<32x64xbf16>, vector<8x64xf32> -> vector<8x64xf32>
    %c0_54 = arith.constant 0 : index
    %c0_55 = arith.constant 0 : index
    %c0_56 = arith.constant 0 : index
    %156 = vector.load %arg10[%c0_54, %c0_55, %c0_56] : memref<1x1x64xf32, #tpu.memory_space<vmem>>, vector<1x1x64xf32>
    %157 = vector.shape_cast %156 : vector<1x1x64xf32> to vector<1x64xf32>
    %158 = vector.broadcast %157 : vector<1x64xf32> to vector<8x64xf32>
    %159 = arith.addf %155, %158 : vector<8x64xf32>
    %cst_57 = arith.constant 0.000000e+00 : f32
    %160 = vector.broadcast %cst_57 : f32 to vector<8x64xf32>
    %161 = arith.maximumf %159, %160 : vector<8x64xf32>
    %162 = arith.truncf %161 : vector<8x64xf32> to vector<8x64xbf16>
    %c0_58 = arith.constant 0 : index
    %c0_59 = arith.constant 0 : index
    %c0_60 = arith.constant 0 : index
    %163 = vector.load %arg11[%c0_58, %c0_59, %c0_60] : memref<1x64x32xbf16, #tpu.memory_space<vmem>>, vector<1x64x32xbf16>
    %164 = vector.shape_cast %163 : vector<1x64x32xbf16> to vector<64x32xbf16>
    %cst_61 = arith.constant dense<0.000000e+00> : vector<8x32xf32>
    %165 = tpu.matmul %162, %164, %cst_61 {dimension_numbers = #tpu.dot_dimension_numbers<[1], [0], [0], [1], [0, 0, 1, 1], [], []>} : vector<8x64xbf16>, vector<64x32xbf16>, vector<8x32xf32> -> vector<8x32xf32>
    %c0_62 = arith.constant 0 : index
    %c0_63 = arith.constant 0 : index
    %c0_64 = arith.constant 0 : index
    %166 = vector.load %arg12[%c0_62, %c0_63, %c0_64] : memref<1x1x32xf32, #tpu.memory_space<vmem>>, vector<1x1x32xf32>
    %167 = vector.shape_cast %166 : vector<1x1x32xf32> to vector<1x32xf32>
    %168 = vector.broadcast %167 : vector<1x32xf32> to vector<8x32xf32>
    %169 = arith.addf %165, %168 : vector<8x32xf32>
    %170 = arith.addf %151, %169 : vector<8x32xf32>
    %c0_65 = arith.constant 0 : index
    %c0_66 = arith.constant 0 : index
    %c0_67 = arith.constant 0 : index
    %171 = vector.load %arg13[%c0_65, %c0_66, %c0_67] : memref<1x1x32xf32, #tpu.memory_space<vmem>>, vector<1x1x32xf32>
    %172 = vector.shape_cast %171 : vector<1x1x32xf32> to vector<1x32xf32>
    %c0_68 = arith.constant 0 : index
    %c0_69 = arith.constant 0 : index
    %c0_70 = arith.constant 0 : index
    %173 = vector.load %arg14[%c0_68, %c0_69, %c0_70] : memref<1x1x32xf32, #tpu.memory_space<vmem>>, vector<1x1x32xf32>
    %174 = vector.shape_cast %173 : vector<1x1x32xf32> to vector<1x32xf32>
    %cst_71 = arith.constant dense<0.000000e+00> : vector<8xf32>
    %175 = vector.multi_reduction <add>, %170, %cst_71 [1] : vector<8x32xf32> to vector<8xf32>
    %176 = vector.shape_cast %175 : vector<8xf32> to vector<8x1xf32>
    %cst_72 = arith.constant 3.200000e+01 : f32
    %177 = vector.broadcast %cst_72 : f32 to vector<8x1xf32>
    %178 = arith.divf %176, %177 : vector<8x1xf32>
    %179 = vector.broadcast %178 : vector<8x1xf32> to vector<8x32xf32>
    %180 = arith.subf %170, %179 : vector<8x32xf32>
    %181 = arith.mulf %180, %180 : vector<8x32xf32>
    %cst_73 = arith.constant dense<0.000000e+00> : vector<8xf32>
    %182 = vector.multi_reduction <add>, %181, %cst_73 [1] : vector<8x32xf32> to vector<8xf32>
    %183 = vector.shape_cast %182 : vector<8xf32> to vector<8x1xf32>
    %cst_74 = arith.constant 3.200000e+01 : f32
    %184 = vector.broadcast %cst_74 : f32 to vector<8x1xf32>
    %185 = arith.divf %183, %184 : vector<8x1xf32>
    %cst_75 = arith.constant 9.99999974E-6 : f32
    %186 = vector.broadcast %cst_75 : f32 to vector<8x1xf32>
    %187 = arith.addf %185, %186 : vector<8x1xf32>
    %188 = math.rsqrt %187 : vector<8x1xf32>
    %189 = vector.broadcast %188 : vector<8x1xf32> to vector<8x32xf32>
    %190 = arith.mulf %180, %189 : vector<8x32xf32>
    %191 = vector.broadcast %172 : vector<1x32xf32> to vector<8x32xf32>
    %192 = arith.mulf %190, %191 : vector<8x32xf32>
    %193 = vector.broadcast %174 : vector<1x32xf32> to vector<8x32xf32>
    %194 = arith.addf %192, %193 : vector<8x32xf32>
    %c0_76 = arith.constant 0 : index
    %c0_77 = arith.constant 0 : index
    %195 = vector.load %arg16[%c0_76, %c0_77] : memref<8x32xf32, #tpu.memory_space<vmem>>, vector<8x32xf32>
    tpu.vector_store %arg16[%c0_76, %c0_77], %194 {strides = array<i32>} : memref<8x32xf32, #tpu.memory_space<vmem>>, vector<8x32xf32>,
    %c1_i32 = arith.constant 1 : i32
    %196 = arith.cmpi eq, %arg1, %c1_i32 : i32
    %197 = arith.extui %196 : i1 to i32
    %c0_i32_78 = arith.constant 0 : i32
    %198 = arith.cmpi ne, %197, %c0_i32_78 : i32
    scf.if %198 {
      %c0_79 = arith.constant 0 : index
      %c0_80 = arith.constant 0 : index
      %199 = vector.load %arg15[%c0_79, %c0_80] : memref<8x32xf32, #tpu.memory_space<vmem>>, vector<8x32xf32>
      tpu.vector_store %arg15[%c0_79, %c0_80], %194 {strides = array<i32>} : memref<8x32xf32, #tpu.memory_space<vmem>>, vector<8x32xf32>,
    } else {
    }
    return
  }
  func.func @transform_0(%arg0: i32, %arg1: i32) -> (i32, i32) {
    %c0_i32 = arith.constant 0 : i32
    %c0_i32_0 = arith.constant 0 : i32
    return %arg0, %c0_i32 : i32, i32
  }
  func.func @transform_1(%arg0: i32, %arg1: i32) -> (i32, i32, i32) {
    %c0_i32 = arith.constant 0 : i32
    %c0_i32_0 = arith.constant 0 : i32
    %c0_i32_1 = arith.constant 0 : i32
    return %arg1, %c0_i32, %c0_i32_0 : i32, i32, i32
  }
  func.func @transform_2(%arg0: i32, %arg1: i32) -> (i32, i32, i32) {
    %c0_i32 = arith.constant 0 : i32
    %c0_i32_0 = arith.constant 0 : i32
    %c0_i32_1 = arith.constant 0 : i32
    return %arg1, %c0_i32, %c0_i32_0 : i32, i32, i32
  }
  func.func @transform_3(%arg0: i32, %arg1: i32) -> (i32, i32, i32) {
    %c0_i32 = arith.constant 0 : i32
    %c0_i32_0 = arith.constant 0 : i32
    %c0_i32_1 = arith.constant 0 : i32
    return %arg1, %c0_i32, %c0_i32_0 : i32, i32, i32
  }
  func.func @transform_4(%arg0: i32, %arg1: i32) -> (i32, i32, i32) {
    %c0_i32 = arith.constant 0 : i32
    %c0_i32_0 = arith.constant 0 : i32
    %c0_i32_1 = arith.constant 0 : i32
    return %arg1, %c0_i32, %c0_i32_0 : i32, i32, i32
  }
  func.func @transform_5(%arg0: i32, %arg1: i32) -> (i32, i32, i32) {
    %c0_i32 = arith.constant 0 : i32
    %c0_i32_0 = arith.constant 0 : i32
    %c0_i32_1 = arith.constant 0 : i32
    return %arg1, %c0_i32, %c0_i32_0 : i32, i32, i32
  }
  func.func @transform_6(%arg0: i32, %arg1: i32) -> (i32, i32, i32) {
    %c0_i32 = arith.constant 0 : i32
    %c0_i32_0 = arith.constant 0 : i32
    %c0_i32_1 = arith.constant 0 : i32
    return %arg1, %c0_i32, %c0_i32_0 : i32, i32, i32
  }
  func.func @transform_7(%arg0: i32, %arg1: i32) -> (i32, i32, i32) {
    %c0_i32 = arith.constant 0 : i32
    %c0_i32_0 = arith.constant 0 : i32
    %c0_i32_1 = arith.constant 0 : i32
    return %arg1, %c0_i32, %c0_i32_0 : i32, i32, i32
  }
  func.func @transform_8(%arg0: i32, %arg1: i32) -> (i32, i32, i32) {
    %c0_i32 = arith.constant 0 : i32
    %c0_i32_0 = arith.constant 0 : i32
    %c0_i32_1 = arith.constant 0 : i32
    return %arg1, %c0_i32, %c0_i32_0 : i32, i32, i32
  }
  func.func @transform_9(%arg0: i32, %arg1: i32) -> (i32, i32, i32) {
    %c0_i32 = arith.constant 0 : i32
    %c0_i32_0 = arith.constant 0 : i32
    %c0_i32_1 = arith.constant 0 : i32
    return %arg1, %c0_i32, %c0_i32_0 : i32, i32, i32
  }
  func.func @transform_10(%arg0: i32, %arg1: i32) -> (i32, i32, i32) {
    %c0_i32 = arith.constant 0 : i32
    %c0_i32_0 = arith.constant 0 : i32
    %c0_i32_1 = arith.constant 0 : i32
    return %arg1, %c0_i32, %c0_i32_0 : i32, i32, i32
  }
  func.func @transform_11(%arg0: i32, %arg1: i32) -> (i32, i32, i32) {
    %c0_i32 = arith.constant 0 : i32
    %c0_i32_0 = arith.constant 0 : i32
    %c0_i32_1 = arith.constant 0 : i32
    return %arg1, %c0_i32, %c0_i32_0 : i32, i32, i32
  }
  func.func @transform_12(%arg0: i32, %arg1: i32) -> (i32, i32, i32) {
    %c0_i32 = arith.constant 0 : i32
    %c0_i32_0 = arith.constant 0 : i32
    %c0_i32_1 = arith.constant 0 : i32
    return %arg1, %c0_i32, %c0_i32_0 : i32, i32, i32
  }
  func.func @transform_13(%arg0: i32, %arg1: i32) -> (i32, i32) {
    %c0_i32 = arith.constant 0 : i32
    %c0_i32_0 = arith.constant 0 : i32
    return %arg0, %c0_i32 : i32, i32
  }
}

</mosaic_0001>

<bundles_post_ra>
// kernel: tpu_custom_call.1
= control target key start
LH: loop header
LB: loop body
LE: loop exit
PB: predicated region body
PF: predicated region fallthrough
CT: control target
= control target key end

     0   :  { %s3285_s0 = inlined_call_operand.hbm [shape: f32[16,32], index: 0, kind: input, shape index: {}]   ;;  %s3286_s1 = inlined_call_operand.vmem [shape: bf16[2,32,96], index: 1, kind: input, shape index: {}]   ;;  %s3287_s2 = inlined_call_operand.vmem [shape: f32[2,1,96], index: 2, kind: input, shape index: {}]   ;;  %s3288_s3 = inlined_call_operand.vmem [shape: bf16[2,32,32], index: 3, kind: input, shape index: {}]   ;;  %s3289_s4 = inlined_call_operand.hbm [shape: f32[2,1,32], index: 4, kind: input, shape index: {}]   ;;  %s3290_s5 = inlined_call_operand.hbm [shape: f32[2,1,32], index: 5, kind: input, shape index: {}]   ;;  %s3291_s6 = inlined_call_operand.hbm [shape: f32[2,1,32], index: 6, kind: input, shape index: {}]   ;;  %s3292_s7 = inlined_call_operand.vmem [shape: bf16[2,32,64], index: 7, kind: input, shape index: {}]   ;;  %s3293_s8 = inlined_call_operand.hbm [shape: f32[2,1,64], index: 8, kind: input, shape index: {}]   ;;  %s3294_s9 = inlined_call_operand.vmem [shape: bf16[2,64,32], index: 9, kind: input, shape index: {}]   ;;  %s3295_s10 = inlined_call_operand.vmem [shape: f32[2,1,32], index: 10, kind: input, shape index: {}]   ;;  %s3296_s11 = inlined_call_operand.vmem [shape: f32[2,1,32], index: 11, kind: input, shape index: {}]   ;;  %s3297_s12 = inlined_call_operand.vmem [shape: f32[2,1,32], index: 12, kind: input, shape index: {}]   ;;  %s3298_s13 = inlined_call_operand.hbm [shape: f32[16,32], index: 13, kind: output, shape index: {}]  }
   0x1   :  { %3322 = sst [smem:[#allocation32_spill]] %s3285_s0 }
   0x2   :  { %3323 = sst [smem:[#allocation33_spill]] %s3286_s1 }
   0x3   :  { %3324 = sst [smem:[#allocation34_spill]] %s3287_s2 }
   0x4   :  { %3325 = sst [smem:[#allocation35_spill]] %s3288_s3 }
   0x5   :  { %3326 = sst [smem:[#allocation36_spill]] %s3289_s4 }
   0x6   :  { %3327 = sst [smem:[#allocation37_spill]] %s3290_s5 }
   0x7   :  { %3328 = sst [smem:[#allocation38_spill]] %s3291_s6 }
   0x8   :  { %3329 = sst [smem:[#allocation39_spill]] %s3292_s7 }
   0x9   :  { %3330 = sst [smem:[#allocation40_spill]] %s3293_s8 }
   0xa   :  { %3331 = sst [smem:[#allocation41_spill]] %s3294_s9 }
   0xb   :  { %3332 = sst [smem:[#allocation42_spill]] %s3295_s10 }
   0xc   :  { %3333 = sst [smem:[#allocation43_spill]] %s3296_s11 }
   0xd   :  { %3334 = sst [smem:[#allocation44_spill]] %s3297_s12 }
   0xe   :  { %3335 = sst [smem:[#allocation45_spill]] %s3298_s13 }
   0xf   :  { %18 = vsyncpa [#allocation4], 0 }
  0x10   :  { %20 = vsyncpa [#allocation4 + $0x1], 0 }
  0x11   :  { %21 = vsyncpa [#allocation7], 0 }
  0x12   :  { %23 = vsyncpa [#allocation7 + $0x1], 0 }
  0x13   :  { %24 = vsyncpa [#allocation10], 0 }
  0x14   :  { %26 = vsyncpa [#allocation10 + $0x1], 0 }
  0x15   :  { %27 = vsyncpa [#allocation5], 0 }
  0x16   :  { %29 = vsyncpa [#allocation5 + $0x1], 0  ;;  %s2667_s25 = smov 0   ;;  %s2669_s26 = smov 0  }
  0x17   :  { %s2671_s27 = smov 0   ;;  %s2673_s28 = smov 0  }
  0x18   :  { %s2675_s29 = smov 0   ;;  %s2677_s30 = smov 0  }
  0x19   :  { %s2679_s14 = smov 0   ;;  %s2681_s15 = smov 0  }
  0x1a   :  { %s2683_s16 = smov 0   ;;  %s2685_s17 = smov 0  }
  0x1b   :  { %s2687_s18 = smov 0  }
  0x1c LB: > { %3336 = sst [smem:[#allocation17_spill]] %s2540_s26  ;;  %s44_s19 = sadd.s32 1, %s2568_s16  ;;  %s2576_s18 = sphi %s2687_s18, %s35_s18   ;;  %s2572_s17 = sphi %s2685_s17, %s3413_s17   ;;  %s2568_s16 = sphi %s2683_s16, %s3412_s16   ;;  %s2564_s15 = sphi %s2681_s15, %s3411_s15   ;;  %s2560_s14 = sphi %s2679_s14, %s3410_s14   ;;  %s2556_s30 = sphi %s2677_s30, %s3409_s30   ;;  %s2552_s29 = sphi %s2675_s29, %s3408_s29   ;;  %s2548_s28 = sphi %s2673_s28, %s3407_s28   ;;  %s2544_s27 = sphi %s2671_s27, %s3406_s27   ;;  %s2540_s26 = sphi %s2669_s26, %s3405_s26   ;;  %s2536_s25 = sphi %s2667_s25, %s3404_s25  }
  0x1d   : > { %3337 = sst [smem:[#allocation18_spill]] %s2544_s27  ;;  %p3304_p0 = scmp.eq.s32.totalorder %s2576_s18, 0 }
  0x1e   : > { %3338 = sst [smem:[#allocation19_spill]] %s2548_s28  ;;  %p2724_p1 = scmp.ge.s32.totalorder %s44_s19, 2 }
  0x1f   : > { %3339 = sst [smem:[#allocation20_spill]] %s2552_s29  ;;  %s158_s21 = sadd.s32 1, %s2544_s27 }
  0x20   : > { %3340 = sst [smem:[#allocation21_spill]] %s2556_s30  ;;  %p165_p2 = scmp.ne.s32.totalorder %s2544_s27, %s2540_s26 }
  0x21   : > { %3341 = sst [smem:[#allocation22_spill]] %s2560_s14  ;;  %s3415_s19 = smov (%p2724_p1, %s44_s19), 0 }
  0x22   : > { %3342 = sst [smem:[#allocation23_spill]] %s2564_s15  ;;  %p167_p4 = por %p165_p2, %p3304_p0 }
  0x23   : > { %3343 = sst [smem:[#allocation24_spill]] %s2568_s16  ;;  %s155_s22 = ssub.s32 %s2568_s16, %s3415_s19 }
  0x24   : > { %3344 = sst [smem:[#allocation25_spill]] %s2572_s17  ;;  %p3303_p5 = scmp.lt.s32.totalorder %s2576_s18, 4 }
  0x25   : > { %s3345_s20 = scalar_select %p2724_p1, 1, 0 }
  0x26   : > { %3346 = sst [smem:[#allocation26_spill]] %s3415_s19  ;;  %p156_p6 = scmp.eq.s32.totalorder %s155_s22, 0 }
  0x27   : > { %s3305_s23 = sand.u32 1, %s2576_s18   ;;  %s2744_s24 = sand.u32 1, %s2544_s27  }
  0x28   : > { %s2747_s13 = scalar_select %p156_p6, %s2544_s27, %s158_s21  }
  0x29   : > { %s2750_s15 = sshll.u32 %s2568_s16, 4  ;;  %s3348_s4 = sld [smem:[#allocation36_spill]] }
  0x2a   : > { %3347 = sst [smem:[#allocation27_spill]] %s2747_s13  ;;  %s472_s19 = scalar_lea.vmem [#allocation6], %s2744_s24 }
  0x2b   : > { %s479_s22 = sshll.u32 %s472_s19, 4  ;;  %p2763_p7 = pnand %p3303_p5, %p167_p4  ;;  %s2759_s22 = int_to_ptr.vmem [resolvable:$true] %s479_s22 }
  0x2c   : > { %s2771_s11 = scalar_lea.sflag [#allocation7], %s3305_s23 }
  0x2d   : > { %s3349_s21 = scalar_select %p2763_p7, 1, 0 }
  0x2e   : > { %p2777_p11 = pneg %p2763_p7 }
  0x2f   : > { %s2756_s10 = scalar_lea.hbm %s3348_s4, %s2750_s15  ;;  %s2301_s27 = scalar_lea.hbm %s3348_s4, 32 }
  0x30   : > { %s2296_s12 = scalar_lea.hbm %s2756_s10, 16  ;;  %p2302_p2 = scmp.lt.u32.totalorder %s2756_s10, %s3348_s4 }
  0x31   : > { %p2297_p10 = scmp.ne.s32.totalorder %s2756_s10, %s2296_s12  ;;  %p2303_p4 = scmp.lt.u32.totalorder %s2301_s27, %s2296_s12 }
  0x32   : > { %p2305_p5 = scmp.lt.u32.totalorder %s2296_s12, %s2756_s10 }
  0x33   : > { %p2299_p12 = pnand %p2777_p11, %p2297_p10  ;;  %p2304_p6 = por %p2303_p4, %p2302_p2 }
  0x35   : > { %p2300_p13 = pneg %p2299_p12  ;;  %p2306_p3 = por %p2305_p5, %p2304_p6 }
  0x37   : > { %p2307_p0 = pnand %p2306_p3, %p2300_p13 }
  0x39   : > { %2310 = shalt.err (!%p2307_p0)
}
  0x3a   : > { %s2311_s23 = scalar_lea.vmem %s2759_s22, 16  ;;  %s2578_s13 = smov [#allocation6]  }
  0x3b   : > { %p2312_p10 = scmp.ne.s32.totalorder %s2759_s22, %s2311_s23  ;;  %s2316_s19 = sshll.u32 %s2578_s13, 4  ;;  %s2317_s19 = int_to_ptr.vmem [resolvable:$false] %s2316_s19 }
  0x3c   : > { %s2318_s7 = scalar_lea.vmem %s2317_s19, 32  ;;  %p2319_p9 = scmp.lt.s32.totalorder %s2759_s22, %s2317_s19 }
  0x3d   : > { %p2314_p12 = pnand %p2312_p10, %p2777_p11  ;;  %p2320_p1 = scmp.lt.s32.totalorder %s2318_s7, %s2311_s23 }
  0x3f   : > { %p2315_p8 = pneg %p2314_p12  ;;  %p2321_p2 = por %p2320_p1, %p2319_p9 }
  0x41   : > { %p2322_p4 = pnand %p2321_p2, %p2315_p8 }
  0x43   : > { %2325 = shalt.err (!%p2322_p4)
}
  0x44   : > { %2151 = dma.hbm_to_vmem [thread:$0]  (!%p2763_p7), %s2756_s10, 16, %s2759_s22, %s2771_s11  }
  0x45   : > { %p3351_p0 = scmp.lt.s32.totalorder %s2576_s18, 5  ;;  %p3352_p3 = scmp.ge.s32.totalorder %s2576_s18, 1 }
  0x46   : > { %s3354_s6 = sld [smem:[#allocation38_spill]]  ;;  %s506_s13 = scalar_lea.vmem [#allocation9], %s2744_s24 }
  0x47   : > { %p2805_p5 = pnand %p3352_p3, %p3351_p0  ;;  %s513_s19 = sshll.u32 %s506_s13, 4  ;;  %s514_s19 = int_to_ptr.vmem [resolvable:$true] %s513_s19 }
  0x48   : > { %s3355_s7 = sand.u32 1, %s2576_s18  }
  0x49   : > { %s3353_s9 = scalar_select %p2805_p5, 1, 0 }
  0x4a   : > { %s2818_s10 = scalar_lea.sflag [#allocation10], %s3355_s7 }
  0x4c   : > { %s2813_s12 = scalar_lea.hbm %s3354_s6, %s2750_s15  ;;  %s2331_s27 = scalar_lea.hbm %s3354_s6, 32 }
  0x4d   : > { %s2326_s22 = scalar_lea.hbm %s2813_s12, 16  ;;  %p2332_p13 = scmp.lt.u32.totalorder %s2813_s12, %s3354_s6 }
  0x4e   : > { %p2327_p1 = scmp.ne.s32.totalorder %s2813_s12, %s2326_s22  ;;  %p2333_p6 = scmp.lt.u32.totalorder %s2331_s27, %s2326_s22 }
  0x4f   : > { %p2335_p12 = scmp.lt.u32.totalorder %s2326_s22, %s2813_s12 }
  0x50   : > { %p2329_p8 = pnand %p2327_p1, %p2777_p11  ;;  %p2334_p10 = por %p2333_p6, %p2332_p13 }
  0x52   : > { %p2330_p9 = pneg %p2329_p8  ;;  %p2336_p2 = por %p2335_p12, %p2334_p10 }
  0x54   : > { %p2337_p4 = pnand %p2336_p2, %p2330_p9 }
  0x56   : > { %2340 = shalt.err (!%p2337_p4)
}
  0x57   : > { %s2341_s13 = scalar_lea.vmem %s514_s19, 16  ;;  %s2579_s7 = smov [#allocation9]  }
  0x58   : > { %p2342_p0 = scmp.ne.s32.totalorder %s514_s19, %s2341_s13  ;;  %s2346_s2 = sshll.u32 %s2579_s7, 4  ;;  %s2347_s2 = int_to_ptr.vmem [resolvable:$false] %s2346_s2 }
  0x59   : > { %s2348_s3 = scalar_lea.vmem %s2347_s2, 32  ;;  %p2349_p8 = scmp.lt.s32.totalorder %s514_s19, %s2347_s2 }
  0x5a   : > { %p2344_p3 = pnand %p2342_p0, %p2777_p11  ;;  %p2350_p5 = scmp.lt.s32.totalorder %s2348_s3, %s2341_s13 }
  0x5c   : > { %p2345_p1 = pneg %p2344_p3  ;;  %p2351_p7 = por %p2350_p5, %p2349_p8 }
  0x5e   : > { %p2352_p6 = pnand %p2351_p7, %p2345_p1 }
  0x60   : > { %2355 = shalt.err (!%p2352_p6)
}
  0x61   : > { %p3356_p13 = scmp.ne.s32.totalorder %s3349_s21, 0  ;;  %s2839_s1 = sadd.s32 4294967295, %s2576_s18  }
  0x62   : > { %s1937_s2 = sadd.s32 4294967294, %s2576_s18   ;;  %s47_s4 = sadd.s32 1, %s2572_s17 }
  0x63   : > { %2157 = dma.hbm_to_vmem [thread:$0]  (!%p3356_p13), %s2813_s12, 16, %s514_s19, %s2818_s10  }
  0x64   : > { %p3357_p7 = scmp.ne.s32.totalorder %s3345_s20, 0  ;;  %s54_s22 = sadd.s32 1, %s2556_s30 }
  0x65   : > { %p61_p5 = scmp.ne.s32.totalorder %s2556_s30, %s2552_s29  ;;  %p67_p10 = scmp.ne.s32.totalorder %s2552_s29, %s2548_s28 }
  0x66   : > { %s3417_s4 = smov (!%p3357_p7, %s47_s4), %s2572_s17  ;;  %p3358_p12 = scmp.eq.s32.totalorder %s2576_s18, 0 }
  0x67   : > { %p49_p9 = scmp.ge.s32.totalorder %s3417_s4, 2  ;;  %p68_p4 = scmp.eq.s32.totalorder %s2839_s1, 0 }
  0x68   : > { %p2853_p2 = por %p3358_p12, %p61_p5  ;;  %p3362_p3 = scmp.ne.s32.totalorder %s2540_s26, %s2536_s25 }
  0x69   : > { %s3419_s4 = smov (%p49_p9, %s3417_s4), 0  ;;  %p2863_p0 = por %p68_p4, %p67_p10 }
  0x6a   : > { %3360 = sst [smem:[#allocation28_spill]] %s3419_s4  ;;  %p2870_p1 = por %p3362_p3, %p68_p4 }
  0x6b   : > { %s3361_s20 = scalar_select %p2863_p0, 1, 0 }
  0x6c   : > { %s3363_s19 = scalar_select %p2870_p1, 1, 0 }
  0x6d   : > { %s51_s27 = ssub.s32 %s2572_s17, %s3419_s4  ;;  %p403_p8 = scmp.eq.s32.totalorder %s2839_s1, 3 }
  0x6e   : > { %3364 = sst [smem:[#allocation29_spill]] %s3363_s19  ;;  %p52_p6 = scmp.eq.s32.totalorder %s51_s27, 0 }
  0x6f   : > { %p409_p7 = scmp.eq.s32.totalorder %s1937_s2, 3  ;;  %p2877_p9 = por %p403_p8, %p61_p5 }
  0x70   : > { %s429_s13 = sand.u32 1, %s2556_s30   ;;  %s1941_s6 = sshll.u32 %s2572_s17, 7 }
  0x71   : > { %s3365_s23 = scalar_select %p2877_p9, 1, 0 }
  0x72   : > { %s2883_s7 = scalar_select %p52_p6, %s2556_s30, %s54_s22  }
  0x73   : > { %p2888_p12 = por %p409_p7, %p67_p10  ;;  %s1940_s25 = sshll.u32 %s429_s13, 3 }
  0x74   : > { %3366 = sst [smem:[#allocation30_spill]] %s2883_s7  ;;  %s3369_s0 = sld [smem:[#allocation32_spill]] }
  0x75   : > { %s3367_s3 = scalar_select %p2888_p12, 1, 0 }
  0x76   : > { %s433_s2 = scalar_lea.vmem [#allocation3], %s1940_s25  ;;  %p3370_p5 = scmp.lt.s32.totalorder %s2576_s18, 4 }
  0x77   : > { %3368 = sst [smem:[#allocation31_spill]] %s3367_s3  ;;  %s440_s27 = sshll.u32 %s433_s2, 4  ;;  %s2906_s27 = int_to_ptr.vmem [resolvable:$true] %s440_s27 }
  0x78   : > { %p2902_p4 = pnand %p3370_p5, %p2853_p2  ;;  %s3372_s5 = sld [smem:[#allocation37_spill]] }
  0x79   : > { %s430_s19 = scalar_lea.sflag [#allocation4], %s429_s13 }
  0x7a   : > { %s2896_s4 = scalar_lea.hbm %s3369_s0, %s1941_s6  ;;  %p2358_p3 = pneg %p2902_p4 }
  0x7b   : > { %s2356_s7 = scalar_lea.hbm %s2896_s4, 128  ;;  %s2361_s2 = scalar_lea.hbm %s3369_s0, 256 }
  0x7c   : > { %p2357_p10 = scmp.ne.s32.totalorder %s2896_s4, %s2356_s7  ;;  %p2362_p6 = scmp.lt.u32.totalorder %s2896_s4, %s3369_s0 }
  0x7d   : > { %p2363_p7 = scmp.lt.u32.totalorder %s2361_s2, %s2356_s7  ;;  %p2365_p12 = scmp.lt.u32.totalorder %s2356_s7, %s2896_s4 }
  0x7e   : > { %s2912_s6 = scalar_lea.hbm %s3372_s5, %s2750_s15  ;;  %p2359_p2 = pnand %p2358_p3, %p2357_p10 }
  0x7f   : > { %p2364_p5 = por %p2363_p7, %p2362_p6 }
  0x80   : > { %p2360_p8 = pneg %p2359_p2 }
  0x81   : > { %p2366_p9 = por %p2365_p12, %p2364_p5 }
  0x83   : > { %p2367_p1 = pnand %p2366_p9, %p2360_p8 }
  0x85   : > { %2370 = shalt.err (!%p2367_p1)
}
  0x86   : > { %s2371_s17 = scalar_lea.vmem %s2906_s27, 128  ;;  %s2580_s13 = smov [#allocation3]  }
  0x87   : > { %p2372_p10 = scmp.ne.s32.totalorder %s2906_s27, %s2371_s17  ;;  %s2376_s14 = sshll.u32 %s2580_s13, 4  ;;  %s2377_s14 = int_to_ptr.vmem [resolvable:$false] %s2376_s14 }
  0x88   : > { %s2378_s30 = scalar_lea.vmem %s2377_s14, 256  ;;  %p2379_p13 = scmp.lt.s32.totalorder %s2906_s27, %s2377_s14 }
  0x89   : > { %p2374_p2 = pnand %p2372_p10, %p2358_p3  ;;  %p2380_p6 = scmp.lt.s32.totalorder %s2378_s30, %s2371_s17 }
  0x8b   : > { %p2375_p0 = pneg %p2374_p2  ;;  %p2381_p7 = por %p2380_p6, %p2379_p13 }
  0x8d   : > { %p2382_p12 = pnand %p2381_p7, %p2375_p0 }
  0x8f   : > { %2385 = shalt.err (!%p2382_p12)
}
  0x90   : > { %2148 = dma.hbm_to_vmem [thread:$0]  (!%p2902_p4), %s2896_s4, 128, %s2906_s27, %s430_s19  }
  0x91   : > { %s489_s7 = scalar_lea.vmem [#allocation8], %s2744_s24  ;;  %s3373_s8 = sld [smem:[#allocation40_spill]] }
  0x92   : > { %s496_s3 = sshll.u32 %s489_s7, 4  ;;  %s2386_s17 = scalar_lea.hbm %s2912_s6, 16  ;;  %s497_s3 = int_to_ptr.vmem [resolvable:$true] %s496_s3 }
  0x93   : > { %p2387_p13 = scmp.ne.s32.totalorder %s2912_s6, %s2386_s17  ;;  %s2391_s14 = scalar_lea.hbm %s3372_s5, 32 }
  0x94   : > { %p2392_p9 = scmp.lt.u32.totalorder %s2912_s6, %s3372_s5  ;;  %p2393_p4 = scmp.lt.u32.totalorder %s2391_s14, %s2386_s17 }
  0x95   : > { %p2389_p0 = pnand %p2387_p13, %p2777_p11  ;;  %p2395_p8 = scmp.lt.u32.totalorder %s2386_s17, %s2912_s6 }
  0x96   : > { %p2394_p3 = por %p2393_p4, %p2392_p9 }
  0x97   : > { %s2944_s2 = scalar_lea.hbm %s3373_s8, %s2750_s15  ;;  %p2390_p1 = pneg %p2389_p0 }
  0x98   : > { %p2396_p5 = por %p2395_p8, %p2394_p3 }
  0x9a   : > { %p2397_p10 = pnand %p2396_p5, %p2390_p1 }
  0x9c   : > { %2400 = shalt.err (!%p2397_p10)
}
  0x9d   : > { %s2401_s15 = scalar_lea.vmem %s497_s3, 16  ;;  %s2581_s4 = smov [#allocation8]  }
  0x9e   : > { %p2402_p2 = scmp.ne.s32.totalorder %s497_s3, %s2401_s15  ;;  %s2406_s27 = sshll.u32 %s2581_s4, 4  ;;  %s2407_s27 = int_to_ptr.vmem [resolvable:$false] %s2406_s27 }
  0x9f   : > { %s2408_s19 = scalar_lea.vmem %s2407_s27, 32  ;;  %p2409_p12 = scmp.lt.s32.totalorder %s497_s3, %s2407_s27 }
  0xa0   : > { %p2404_p6 = pnand %p2402_p2, %p2777_p11  ;;  %p2410_p13 = scmp.lt.s32.totalorder %s2408_s19, %s2401_s15 }
  0xa2   : > { %p2405_p7 = pneg %p2404_p6  ;;  %p2411_p0 = por %p2410_p13, %p2409_p12 }
  0xa4   : > { %p2412_p4 = pnand %p2411_p0, %p2405_p7 }
  0xa6   : > { %2415 = shalt.err (!%p2412_p4)
}
  0xa7   : > { %p3374_p9 = scmp.ne.s32.totalorder %s3349_s21, 0  ;;  %s531_s0 = scalar_lea.vmem [#allocation11], %s2744_s24 }
  0xa8   : > { %s538_s7 = sshll.u32 %s531_s0, 4  ;;  %s2416_s12 = scalar_lea.hbm %s2944_s2, 16  ;;  %s539_s7 = int_to_ptr.vmem [resolvable:$true] %s538_s7 }
  0xa9   : > { %2154 = dma.hbm_to_vmem [thread:$0]  (!%p3374_p9), %s2912_s6, 16, %s497_s3, %s2771_s11  }
  0xaa   : > { %p2417_p1 = scmp.ne.s32.totalorder %s2944_s2, %s2416_s12  ;;  %s2421_s22 = scalar_lea.hbm %s3373_s8, 32 }
  0xab   : > { %p2422_p5 = scmp.lt.u32.totalorder %s2944_s2, %s3373_s8  ;;  %p2423_p10 = scmp.lt.u32.totalorder %s2421_s22, %s2416_s12 }
  0xac   : > { %p2419_p3 = pnand %p2417_p1, %p2777_p11  ;;  %p2425_p6 = scmp.lt.u32.totalorder %s2416_s12, %s2944_s2 }
  0xad   : > { %p2424_p2 = por %p2423_p10, %p2422_p5 }
  0xae   : > { %p2420_p8 = pneg %p2419_p3 }
  0xaf   : > { %p2426_p7 = por %p2425_p6, %p2424_p2 }
  0xb1   : > { %p2427_p12 = pnand %p2426_p7, %p2420_p8 }
  0xb3   : > { %2430 = shalt.err (!%p2427_p12)
}
  0xb4   : > { %s2431_s24 = scalar_lea.vmem %s539_s7, 16  ;;  %s2582_s11 = smov [#allocation11]  }
  0xb5   : > { %p2432_p13 = scmp.ne.s32.totalorder %s539_s7, %s2431_s24  ;;  %s2436_s6 = sshll.u32 %s2582_s11, 4  ;;  %s2437_s6 = int_to_ptr.vmem [resolvable:$false] %s2436_s6 }
  0xb6   : > { %s2438_s3 = scalar_lea.vmem %s2437_s6, 32  ;;  %p2439_p1 = scmp.lt.s32.totalorder %s539_s7, %s2437_s6 }
  0xb7   : > { %p2434_p0 = pnand %p2432_p13, %p2777_p11  ;;  %p2440_p3 = scmp.lt.s32.totalorder %s2438_s3, %s2431_s24 }
  0xb9   : > { %p2435_p4 = pneg %p2434_p0  ;;  %p2441_p9 = por %p2440_p3, %p2439_p1 }
  0xbb   : > { %p2442_p5 = pnand %p2441_p9, %p2435_p4 }
  0xbd   : > { %2445 = shalt.err (!%p2442_p5)
}
  0xbe   : > { %p3375_p10 = scmp.ne.s32.totalorder %s3349_s21, 0  ;;  %p3376_p8 = scmp.ne.s32.totalorder %s3353_s9, 0 }
  0xbf   : > { %s2986_s16 = sand.u32 (!%p3376_p8), 1, %s2552_s29   ;;  %p3377_p11 = scmp.ne.s32.totalorder (!%p3376_p8), %s3361_s20, 0 }
  0xc0   : > { %2160 = dma.hbm_to_vmem [thread:$0]  (!%p3375_p10), %s2944_s2, 16, %s539_s7, %s2818_s10  }
  0xc1   : > { %573 = sbr.rel (%p3376_p8) target bundleno = 3923 (0xf53), region = 72  ;;  %s1947_s30 = sshll.u32 (!%p3376_p8), %s2986_s16, 3 }
  0xc2   : > { %s576_s15 = scalar_lea.sflag (!%p3376_p8), [#allocation4], %s2986_s16  ;;  %s579_s4 = scalar_lea.vmem (!%p3376_p8), [#allocation3], %s1947_s30 }
  0xc8   : > { %2519 = dma.done.wait (%p3377_p11), %s576_s15, 128  }
  0xc9   : > { %2521 = vsyncadd (%p3377_p11), %s576_s15, 4294967168  ;;  %s3378_s21 = sld [smem:[#allocation29_spill]]  ;;  %s584_s10 = sand.u32 1, %s2839_s1  }
  0xca   : > { %s2996_s9 = sand.u32 1, %s2540_s26   ;;  %s585_s2 = scalar_lea.sflag [#allocation7], %s584_s10 }
  0xcf   : > { %p3379_p9 = scmp.ne.s32.totalorder %s3378_s21, 0 }
  0xd1   : > { %2523 = dma.done.wait (%p3379_p9), %s585_s2, 32  }
  0xd2   : > { %2525 = vsyncadd (%p3379_p9), %s585_s2, 4294967264  ;;  %s601_s20 = scalar_lea.sflag [#allocation10], %s584_s10 }
  0xd3   : > { %2527 = dma.done.wait (%p3379_p9), %s601_s20, 32  }
  0xd4   : > { %2529 = vsyncadd (%p3379_p9), %s601_s20, 4294967264  ;;  %s3380_s1 = sld [smem:[#allocation22_spill]]  ;;  %s3383_s21 = sld [smem:[#allocation35_spill]] }
  0xd5   : > { %s3382_s11 = sld [smem:[#allocation33_spill]]  ;;  %s3384_s0 = sld [smem:[#allocation39_spill]] }
  0xd6   : > { %s3385_s29 = sld [smem:[#allocation41_spill]]  ;;  %s3386_s14 = sld [smem:[#allocation42_spill]] }
  0xd7   : > { %s3387_s3 = sld [smem:[#allocation43_spill]]  ;;  %s3388_s28 = sld [smem:[#allocation44_spill]] }
  0xda   : > { %p702_p2 = scmp.lt.s32.totalorder %s3380_s1, 1  ;;  %p1957_p6 = scmp.ne.s32.totalorder %s3380_s1, 0 }
  0xdb   : > { %v739_v0 = vld [vmem:[%s579_s4] sm:$0xff] (!%p1957_p6)  ;;  %vm740_vm0 = vcmask (!%p1957_p6), 261120  }
  0xdc   : > { %s3011_s7 = scalar_select %p702_p2, %s3380_s1, 1 }
  0xdd   : > { %738 = sbr.rel (%p1957_p6) target bundleno = 228 (0xe4), region = 96  ;;  %741 = vst.msk [vmem:[#allocation2] sm:$0xff] (!%p1957_p6), %vm740_vm0, %v739_v0 }
  0xde   : > { %s1994_s12 = sshll.u32 %s3011_s7, 4  ;;  %s1997_s27 = sshll.u32 %s3011_s7, 5 }
  0xdf   : > { %s706_s6 = scalar_lea.vmem %s3382_s11, %s1994_s12  ;;  %s3024_s10 = scalar_lea.vmem %s3383_s21, %s1994_s12 }
  0xe0   : > { %s3029_s19 = scalar_lea.vmem %s3384_s0, %s1994_s12  ;;  %s3035_s25 = scalar_lea.vmem %s3385_s29, %s1997_s27 }
  0xe1   : > { %s727_s24 = scalar_lea.vmem %s3386_s14, %s3011_s7  ;;  %s730_s15 = scalar_lea.vmem %s3387_s3, %s3011_s7 }
  0xe2   : > { %s733_s2 = scalar_lea.vmem %s3388_s28, %s3011_s7  ;;  %s611_s0 = scalar_lea.vmem [#allocation11], %s2996_s9 }
  0xe3   : > { %s3050_s12 = scalar_lea.vmem [#allocation12], %s1947_s30 }
  0xe4 PF: > { %v2268_v1 = vld [vmem:[%s706_s6] sm:$0xff]   ;;  %v2583_v2 = vmov 0.0   ;;  %v2269_v3 = vld [vmem:[%s706_s6 + $0x8] sm:$0xff]   ;;  %vm2584_vm1 = vmmov 0   ;;  %vm767_vm2 = vcmask 261120   ;;  %s3389_s26 = sld [smem:[#allocation34_spill]]  ;;  %v811_v18 = vlaneseq }
  0xe5   : > { %2033 = vmatprep.subr.bf16.mxu1 %v2583_v2  ;;  %2047 = vmatprep.subr.bf16.mxu0 %v2583_v2  ;;  %v3057_v4 = vld [vmem:[#allocation2] sm:$0xff]  ;;  %s2585_s29 = smov 120   ;;  %s2586_s30 = smov 96   ;;  %vm824_vm3 = vcmask 64512   ;;  %vm889_vm5 = vcmask 1043456   ;;  %vm1603_vm6 = vcmask 523264  }
  0xe6   : > { %2034 = vmatpush3.bf16.msra.mxu1 %v2268_v1  ;;  %2037 = vmatprep.mubr.msk.bf16.mxu1 %vm2584_vm1, %v2583_v2  ;;  %v743_v5 = vpack.c.bf16 %v3057_v4, %v3057_v4  ;;  %s2587_s4 = smov 88   ;;  %v3089_v19 = vshrl.u32 %v811_v18, 7  ;;  %v3091_v20 = vand.u32 127, %v811_v18  ;;  %s2588_s27 = smov 64   ;;  %v816_v55 = vld [vmem:[%s3024_s10] sm:$0xf] }
  0xe7   : > { %2035 = vmatprep.subr.bf16.mxu1 %v2583_v2  ;;  %2049 = vmatprep.mubr.msk.bf16.mxu0 %vm2584_vm1, %v2583_v2  ;;  %s2589_s1 = smov 56   ;;  %s2590_s13 = smov 112   ;;  %v1096_v56 = vsel %vm889_vm5, %v816_v55, 0  ;;  %v817_v57 = vld [vmem:[%s3024_s10 + $0x4] sm:$0xf] }
  0xe8   : > { %vm815_vm4 = vcmp.le.s32.totalorder %v3091_v20, %v3089_v19  ;;  %s2591_s6 = smov 80   ;;  %v1050_v58 = vsel %vm889_vm5, %v817_v57, 0  ;;  %s2592_s20 = smov 72  }
  0xe9   : > { %s2593_s17 = smov 104   ;;  %s2594_s22 = smov 48  }
  0xea   : > { %2036 = vmatpush3.bf16.msra.mxu1 %v2269_v3  ;;  %s3390_s28 = scalar_lea.vmem %s3389_s26, %s3011_s7  ;;  %s2595_s14 = smov 40  }
  0xeb   : > { %2041 = vmatprep.subr.bf16.mxu1 %v2583_v2  ;;  %v1958_v6 = vld [vmem:[%s3390_s28] ss:$0 sm:$0xff]  ;;  %s3393_s11 = scalar_lea.vmem [#allocation9], %s2996_s9  ;;  %s3397_s28 = sld [smem:[#allocation22_spill]] }
  0xed   : > { %2038 = vmatmul.mubr.msk.bf16.vlgmr.msra.gmra.mrb[0].mxu1 %vm767_vm2, %v743_v5 }
  0xee   : > { %2043 = vmatprep.mubr.msk.bf16.mxu1 %vm2584_vm1, %v2583_v2 }
  0xf1   : > { %p1989_p7 = scmp.ne.s32.totalorder %s3397_s28, 1 }
 0x1c0   : > { %v805_v7 = vpop.f32.mrb[0].mxu1 }
 0x1c1   : > { %v806_v8 = vadd.f32 %v1958_v6, %v805_v7  ;;  %v2039_v9 = vpop.f32.mrb[1].mxu1 }
 0x1c2   : > { %v808_v10 = vpop.f32.mrb[2].mxu1 }
 0x1c3   : > { %v3073_v11 = vpack.c.bf16 %v806_v8, %v806_v8  ;;  %v2040_v12 = vpop.f32.mrb[3].mxu1 }
 0x1c5   : > { %934 = vrot.lane.b32.xlu1 %v3073_v11, %s2585_s29  ;;  %822 = vrot.lane.b32.xlu0 %v3073_v11, %s2586_s30 }
 0x1c9   : > { %936 = vrot.lane.b32.xlu0 %v3073_v11, %s2587_s4 }
 0x237   : > { %v823_v13 = vpop.permute.xlu0 %822  ;;  %v935_v17 = vpop.permute.xlu1 %934 }
 0x238   : > { %v829_v14 = vsel %vm824_vm3, %v823_v13, 0 }
 0x239   : > { %2042 = vmatpush3.bf16.xpose.msra.mxu1 %v829_v14 }
 0x23a   : > { %2053 = vmatprep.subr.bf16.mxu1 %v2583_v2 }
 0x23b   : > { %v937_v15 = vpop.permute.xlu0 %936 }
 0x23c   : > { %v942_v16 = vsel %vm824_vm3, %v937_v15, 0 }
 0x240   : > { %2044 = vmatmul.mubr.msk.bf16.vlgmr.msra.gmra.mrb[4].mxu1 %vm824_vm3, %v3073_v11 }
 0x241   : > { %2054 = vmatpush3.bf16.xpose.msra.mxu1 %v942_v16  ;;  %2055 = vmatprep.mubr.msk.bf16.mxu1 %vm2584_vm1, %v2583_v2 }
 0x242   : > { %2065 = vmatprep.subr.bf16.mxu1 %v2583_v2 }
 0x248   : > { %2056 = vmatmul.mubr.msk.bf16.vlgmr.msra.gmra.mrb[8].mxu1 %vm824_vm3, %v935_v17 }
 0x249   : > { %2067 = vmatprep.mubr.msk.bf16.mxu1 %vm2584_vm1, %v2583_v2  ;;  %2066 = vmatpush3.bf16.msra.mxu1 %v1050_v58 }
 0x24a   : > { %2077 = vmatprep.subr.bf16.mxu1 %v2583_v2 }
 0x313   : > { %v865_v21 = vpop.f32.mrb[4].mxu1 }
 0x314   : > { %v871_v22 = vsel %vm815_vm4, %v865_v21, -inf  ;;  %v2045_v23 = vpop.f32.mrb[5].mxu1 }
 0x315   : > { %v868_v24 = vpop.f32.mrb[6].mxu1  ;;  %v872_v25 = vsel %vm824_vm3, %v871_v22, -inf }
 0x316   : > { %873 = vmax.xlane.f32.xlu1 %v872_v25  ;;  %v2046_v26 = vpop.f32.mrb[7].mxu1 }
 0x31b   : > { %v978_v27 = vpop.f32.mrb[8].mxu1 }
 0x31c   : > { %v984_v28 = vsel %vm815_vm4, %v978_v27, -inf  ;;  %v2057_v29 = vpop.f32.mrb[9].mxu1 }
 0x31d   : > { %v981_v30 = vpop.f32.mrb[10].mxu1  ;;  %v985_v31 = vsel %vm824_vm3, %v984_v28, -inf }
 0x31e   : > { %986 = vmax.xlane.f32.xlu0 %v985_v31  ;;  %v2058_v32 = vpop.f32.mrb[11].mxu1 }
 0x3a3   : > { %v874_v33 = vpop.xlane.xlu1 %873 }
 0x3a4   : > { %v875_v34 = vsub.f32 %v871_v22, %v874_v33 }
 0x3a6   : > { %v876_v35 = vmul.f32 1.442695, %v875_v34 }
 0x3a8   : > { %2276 = vpow2.f32 %v876_v35 }
 0x3ab   : > { %v987_v36 = vpop.xlane.xlu0 %986 }
 0x3ac   : > { %v988_v37 = vsub.f32 %v984_v28, %v987_v36 }
 0x3ae   : > { %v989_v38 = vmul.f32 1.442695, %v988_v37 }
 0x3b0   : > { %2278 = vpow2.f32 %v989_v38 }
 0x3b2   : > { %v2277_v39 = vpop.eup %2276 }
 0x3b3   : > { %v878_v40 = vsel %vm824_vm3, %v2277_v39, 0.0 }
 0x3b4   : > { %879 = vadd.xlane.f32.xlu0 %v878_v40 }
 0x3ba   : > { %v2279_v41 = vpop.eup %2278 }
 0x3bb   : > { %v991_v42 = vsel %vm824_vm3, %v2279_v41, 0.0 }
 0x3bc   : > { %992 = vadd.xlane.f32.xlu1 %v991_v42  ;;  %v818_v42 = vld [vmem:[%s3024_s10 + $0x8] sm:$0xf] }
 0x3ca   : > { %884 = vrot.lane.b32.xlu0 %v3073_v11, %s2588_s27 }
 0x3cd   : > { %997 = vrot.lane.b32.xlu1 %v3073_v11, %s2589_s1 }
 0x3ce   : > { %1138 = vrot.lane.b32.xlu0 %v3073_v11, %s2590_s13 }
 0x3d1   : > { %1140 = vrot.lane.b32.xlu1 %v3073_v11, %s2591_s6 }
 0x441   : > { %v880_v43 = vpop.xlane.xlu0 %879 }
 0x442   : > { %2280 = vrcp.f32 %v880_v43  ;;  %v1254_v43 = vsel %vm889_vm5, %v818_v42, 0 }
 0x445   : > { %v885_v44 = vpop.permute.xlu0 %884 }
 0x446   : > { %v891_v45 = vsel %vm889_vm5, %v885_v44, 0 }
 0x447   : > { %2048 = vmatpush3.bf16.msra.mxu0 %v891_v45 }
 0x448   : > { %2059 = vmatprep.subr.bf16.mxu0 %v2583_v2 }
 0x449   : > { %v993_v46 = vpop.xlane.xlu1 %992  ;;  %v1139_v9 = vpop.permute.xlu0 %1138 }
 0x44a   : > { %2282 = vrcp.f32 %v993_v46 }
 0x44c   : > { %v2281_v47 = vpop.eup %2280 }
 0x44d   : > { %v882_v48 = vmul.f32 %v2281_v47, %v2277_v39  ;;  %v998_v49 = vpop.permute.xlu1 %997 }
 0x44e   : > { %v1003_v51 = vsel %vm889_vm5, %v998_v49, 0 }
 0x44f   : > { %v883_v50 = vpack.c.bf16 %v882_v48, %v882_v48 }
 0x451   : > { %2050 = vmatmul.mubr.msk.bf16.vlgmr.msra.gmra.mrb[0].mxu0 %vm824_vm3, %v883_v50  ;;  %v1141_v0 = vpop.permute.xlu1 %1140 }
 0x452   : > { %2060 = vmatpush3.bf16.msra.mxu0 %v1003_v51  ;;  %2061 = vmatprep.mubr.msk.bf16.mxu0 %vm2584_vm1, %v2583_v2  ;;  %v1146_v7 = vsel %vm824_vm3, %v1141_v0, 0 }
 0x453   : > { %2071 = vmatprep.subr.bf16.mxu0 %v2583_v2 }
 0x454   : > { %v2283_v52 = vpop.eup %2282 }
 0x455   : > { %v995_v53 = vmul.f32 %v2283_v52, %v2279_v41 }
 0x457   : > { %v996_v54 = vpack.c.bf16 %v995_v53, %v995_v53 }
 0x459   : > { %2062 = vmatmul.mubr.msk.bf16.vlgmr.msra.gmra.mrb[4].mxu0 %vm824_vm3, %v996_v54 }
 0x45a   : > { %2073 = vmatprep.mubr.msk.bf16.mxu0 %vm2584_vm1, %v2583_v2  ;;  %2072 = vmatpush3.bf16.msra.mxu0 %v1096_v56 }
 0x45b   : > { %2083 = vmatprep.subr.bf16.mxu0 %v2583_v2 }
 0x524   : > { %v927_v59 = vpop.f32.mrb[0].mxu0 }
 0x525   : > { %v933_v60 = vpack.c.bf16 %v927_v59, %v927_v59  ;;  %v2051_v61 = vpop.f32.mrb[1].mxu0 }
 0x526   : > { %v930_v62 = vpop.f32.mrb[2].mxu0 }
 0x527   : > { %v2052_v63 = vpop.f32.mrb[3].mxu0  ;;  %2074 = vmatmul.mubr.msk.bf16.vlgmr.msra.gmra.mrb[8].mxu0 %vm824_vm3, %v933_v60  ;;  %v819_v60 = vld [vmem:[%s3024_s10 + $0xc] sm:$0xf]  ;;  %s3391_s10 = scalar_lea.vmem [#allocation6], %s2996_s9 }
 0x528   : > { %2085 = vmatprep.mubr.msk.bf16.mxu0 %vm2584_vm1, %v2583_v2  ;;  %v1413_v61 = vsel %vm889_vm5, %v819_v60, 0 }
 0x52c   : > { %v1039_v1 = vpop.f32.mrb[4].mxu0 }
 0x52d   : > { %v1045_v3 = vpack.c.bf16 %v1039_v1, %v1039_v1  ;;  %v2063_v5 = vpop.f32.mrb[5].mxu0 }
 0x52e   : > { %v1042_v6 = vpop.f32.mrb[6].mxu0 }
 0x52f   : > { %v2064_v8 = vpop.f32.mrb[7].mxu0  ;;  %2068 = vmatmul.mubr.msk.bf16.vlgmr.msra.gmra.mrb[12].mxu1 %vm824_vm3, %v1045_v3 }
 0x530   : > { %2078 = vmatpush3.bf16.xpose.msra.mxu1 %v1146_v7  ;;  %2079 = vmatprep.mubr.msk.bf16.mxu1 %vm2584_vm1, %v2583_v2 }
 0x531   : > { %2089 = vmatprep.subr.bf16.mxu1 %v2583_v2 }
 0x537   : > { %2080 = vmatmul.mubr.msk.bf16.vlgmr.msra.gmra.mrb[16].mxu1 %vm824_vm3, %v1139_v9 }
 0x538   : > { %2091 = vmatprep.mubr.msk.bf16.mxu1 %vm2584_vm1, %v2583_v2  ;;  %2090 = vmatpush3.bf16.msra.mxu1 %v1254_v43  ;;  %v2274_v43 = vld [vmem:[%s3035_s25 + $0x10] sm:$0xff]  }
 0x539   : > { %2101 = vmatprep.subr.bf16.mxu1 %v2583_v2 }
 0x5fa   : > { %v1132_v10 = vpop.f32.mrb[8].mxu0 }
 0x5fb   : > { %v2075_v12 = vpop.f32.mrb[9].mxu0 }
 0x5fc   : > { %v1135_v13 = vpop.f32.mrb[10].mxu0 }
 0x5fd   : > { %v2076_v14 = vpop.f32.mrb[11].mxu0 }
 0x602   : > { %v1086_v15 = vpop.f32.mrb[12].mxu1 }
 0x603   : > { %v3136_v16 = vadd.f32 %v1132_v10, %v1086_v15  ;;  %v2069_v17 = vpop.f32.mrb[13].mxu1 }
 0x604   : > { %v1089_v18 = vpop.f32.mrb[14].mxu1 }
 0x605   : > { %v2070_v21 = vpop.f32.mrb[15].mxu1  ;;  %v1974_v18 = vld [vmem:[%s3391_s10] ss:$0 sm:$0xff] }
 0x60a   : > { %v1182_v22 = vpop.f32.mrb[16].mxu1 }
 0x60b   : > { %v1188_v23 = vsel %vm815_vm4, %v1182_v22, -inf  ;;  %v2081_v24 = vpop.f32.mrb[17].mxu1 }
 0x60c   : > { %v1185_v25 = vpop.f32.mrb[18].mxu1  ;;  %v1189_v26 = vsel %vm824_vm3, %v1188_v23, -inf }
 0x60d   : > { %1190 = vmax.xlane.f32.xlu1 %v1189_v26  ;;  %v2082_v27 = vpop.f32.mrb[19].mxu1 }
 0x61e   : > { %1299 = vrot.lane.b32.xlu1 %v3073_v11, %s2592_s20 }
 0x622   : > { %1297 = vrot.lane.b32.xlu1 %v3073_v11, %s2593_s17 }
 0x69a   : > { %v1191_v28 = vpop.xlane.xlu1 %1190 }
 0x69b   : > { %v1192_v29 = vsub.f32 %v1188_v23, %v1191_v28 }
 0x69d   : > { %v1193_v30 = vmul.f32 1.442695, %v1192_v29 }
 0x69e   : > { %v1300_v38 = vpop.permute.xlu1 %1299 }
 0x69f   : > { %2284 = vpow2.f32 %v1193_v30  ;;  %v1305_v40 = vsel %vm824_vm3, %v1300_v38, 0  ;;  %v2270_v30 = vld [vmem:[%s3029_s19] sm:$0xff]  }
 0x6a2   : > { %v1298_v41 = vpop.permute.xlu1 %1297 }
 0x6a9   : > { %v2285_v31 = vpop.eup %2284 }
 0x6aa   : > { %v1195_v32 = vsel %vm824_vm3, %v2285_v31, 0.0 }
 0x6ab   : > { %1196 = vadd.xlane.f32.xlu0 %v1195_v32  ;;  %v2273_v32 = vld [vmem:[%s3035_s25 + $0x8] sm:$0xff]  }
 0x6c1   : > { %1201 = vrot.lane.b32.xlu0 %v3073_v11, %s2594_s22 }
 0x738   : > { %v1197_v33 = vpop.xlane.xlu0 %1196 }
 0x739   : > { %2286 = vrcp.f32 %v1197_v33 }
 0x73c   : > { %v1202_v34 = vpop.permute.xlu0 %1201 }
 0x73d   : > { %v1207_v35 = vsel %vm889_vm5, %v1202_v34, 0 }
 0x73e   : > { %2084 = vmatpush3.bf16.msra.mxu0 %v1207_v35 }
 0x73f   : > { %2095 = vmatprep.subr.bf16.mxu0 %v2583_v2 }
 0x743   : > { %v2287_v36 = vpop.eup %2286 }
 0x744   : > { %v1199_v37 = vmul.f32 %v2287_v36, %v2285_v31  ;;  %v2271_v31 = vld [vmem:[%s3029_s19 + $0x8] sm:$0xff]   ;;  %s3392_s19 = scalar_lea.vmem [#allocation8], %s2996_s9 }
 0x746   : > { %v1200_v39 = vpack.c.bf16 %v1199_v37, %v1199_v37  ;;  %v1975_v37 = vld [vmem:[%s3392_s19] ss:$0 sm:$0xff] }
 0x748   : > { %2086 = vmatmul.mubr.msk.bf16.vlgmr.msra.gmra.mrb[12].mxu0 %vm824_vm3, %v1200_v39  ;;  %v1976_v39 = vld [vmem:[%s3393_s11] ss:$0 sm:$0xff] }
 0x749   : > { %2096 = vmatpush3.bf16.xpose.msra.mxu0 %v1305_v40  ;;  %2097 = vmatprep.mubr.msk.bf16.mxu0 %vm2584_vm1, %v2583_v2 }
 0x74a   : > { %2107 = vmatprep.subr.bf16.mxu0 %v2583_v2 }
 0x750   : > { %2098 = vmatmul.mubr.msk.bf16.vlgmr.msra.gmra.mrb[16].mxu0 %vm824_vm3, %v1298_v41 }
 0x751   : > { %2109 = vmatprep.mubr.msk.bf16.mxu0 %vm2584_vm1, %v2583_v2  ;;  %2108 = vmatpush3.bf16.msra.mxu0 %v1413_v61 }
 0x752   : > { %2121 = vmatprep.subr.bf16.mxu0 %v2583_v2 }
 0x81b   : > { %v1243_v44 = vpop.f32.mrb[12].mxu0 }
 0x81c   : > { %v1249_v45 = vpack.c.bf16 %v1243_v44, %v1243_v44  ;;  %v2087_v46 = vpop.f32.mrb[13].mxu0  ;;  %v2275_v44 = vld [vmem:[%s3035_s25 + $0x18] sm:$0xff]  }
 0x81d   : > { %v1246_v47 = vpop.f32.mrb[14].mxu0 }
 0x81e   : > { %v2088_v48 = vpop.f32.mrb[15].mxu0  ;;  %2092 = vmatmul.mubr.msk.bf16.vlgmr.msra.gmra.mrb[20].mxu1 %vm824_vm3, %v1249_v45  ;;  %v1977_v45 = vld [vmem:[%s611_s0] ss:$0 sm:$0xff] }
 0x81f   : > { %2103 = vmatprep.mubr.msk.bf16.mxu1 %vm2584_vm1, %v2583_v2 }
 0x823   : > { %v1341_v49 = vpop.f32.mrb[16].mxu0 }
 0x824   : > { %v1347_v50 = vsel %vm815_vm4, %v1341_v49, -inf  ;;  %v2099_v51 = vpop.f32.mrb[17].mxu0 }
 0x825   : > { %v1344_v52 = vpop.f32.mrb[18].mxu0  ;;  %v1348_v53 = vsel %vm824_vm3, %v1347_v50, -inf }
 0x826   : > { %1349 = vmax.xlane.f32.xlu0 %v1348_v53  ;;  %v2100_v54 = vpop.f32.mrb[19].mxu0  ;;  %v1981_v53 = vld [vmem:[%s727_s24] ss:$0 sm:$0xff] }
 0x83c   : > { %1360 = vrot.lane.b32.xlu0 %v3073_v11, %s2595_s14 }
 0x8b3   : > { %v1350_v55 = vpop.xlane.xlu0 %1349 }
 0x8b4   : > { %v1351_v56 = vsub.f32 %v1347_v50, %v1350_v55 }
 0x8b6   : > { %v1352_v57 = vmul.f32 1.442695, %v1351_v56 }
 0x8b7   : > { %v1361_v58 = vpop.permute.xlu0 %1360 }
 0x8b8   : > { %2288 = vpow2.f32 %v1352_v57  ;;  %v1366_v59 = vsel %vm889_vm5, %v1361_v58, 0 }
 0x8b9   : > { %2102 = vmatpush3.bf16.msra.mxu1 %v1366_v59 }
 0x8ba   : > { %2113 = vmatprep.subr.bf16.mxu1 %v2583_v2 }
 0x8c2   : > { %v2289_v19 = vpop.eup %2288 }
 0x8c3   : > { %v1354_v20 = vsel %vm824_vm3, %v2289_v19, 0.0 }
 0x8c4   : > { %1355 = vadd.xlane.f32.xlu1 %v1354_v20 }
 0x8f1   : > { %v1290_v11 = vpop.f32.mrb[20].mxu1 }
 0x8f2   : > { %v1296_v62 = vadd.f32 %v1290_v11, %v3136_v16  ;;  %v2093_v63 = vpop.f32.mrb[21].mxu1 }
 0x8f3   : > { %v1293_v0 = vpop.f32.mrb[22].mxu1 }
 0x8f4   : > { %v2094_v1 = vpop.f32.mrb[23].mxu1 }
 0x951   : > { %v1356_v3 = vpop.xlane.xlu1 %1355 }
 0x952   : > { %2290 = vrcp.f32 %v1356_v3  ;;  %v1987_v3 = vld [vmem:[%s730_s15] ss:$0 sm:$0xff] }
 0x95c   : > { %v2291_v5 = vpop.eup %2290 }
 0x95d   : > { %v1358_v6 = vmul.f32 %v2291_v5, %v2289_v19 }
 0x95f   : > { %v1359_v7 = vpack.c.bf16 %v1358_v6, %v1358_v6  ;;  %v1988_v6 = vld [vmem:[%s733_s2] ss:$0 sm:$0xff] }
 0x961   : > { %2104 = vmatmul.mubr.msk.bf16.vlgmr.msra.gmra.mrb[24].mxu1 %vm824_vm3, %v1359_v7 }
 0x962   : > { %2117 = vmatprep.mubr.msk.bf16.mxu1 %vm2584_vm1, %v2583_v2  ;;  %2114 = vmatpush3.bf16.msra.mxu1 %v2270_v30 }
 0x963   : > { %2115 = vmatprep.subr.bf16.mxu1 %v2583_v2 }
 0x966   : > { %2116 = vmatpush3.bf16.msra.mxu1 %v2271_v31 }
 0xa34   : > { %v1402_v8 = vpop.f32.mrb[24].mxu1 }
 0xa35   : > { %v1408_v9 = vpack.c.bf16 %v1402_v8, %v1402_v8  ;;  %v2105_v10 = vpop.f32.mrb[25].mxu1 }
 0xa36   : > { %v1405_v12 = vpop.f32.mrb[26].mxu1 }
 0xa37   : > { %v2106_v13 = vpop.f32.mrb[27].mxu1  ;;  %2110 = vmatmul.mubr.msk.bf16.vlgmr.msra.gmra.mrb[20].mxu0 %vm824_vm3, %v1408_v9 }
 0xa38   : > { %2129 = vmatprep.mubr.msk.bf16.mxu0 %vm2584_vm1, %v2583_v2 }
 0xb0a   : > { %v1449_v14 = vpop.f32.mrb[20].mxu0 }
 0xb0b   : > { %v1455_v15 = vadd.f32 %v1449_v14, %v1296_v62  ;;  %v2111_v16 = vpop.f32.mrb[21].mxu0 }
 0xb0c   : > { %v1452_v17 = vpop.f32.mrb[22].mxu0 }
 0xb0d   : > { %v1456_v21 = vadd.f32 %v1455_v15, %v3057_v4  ;;  %v2112_v22 = vpop.f32.mrb[23].mxu0  ;;  %v2272_v4 = vld [vmem:[%s3035_s25] sm:$0xff]  }
 0xb0e   : > { %2122 = vmatpush3.bf16.msra.mxu0 %v2272_v4 }
 0xb0f   : > { %v1464_v23 = vadd.f32 %v1974_v18, %v1456_v21  ;;  %2123 = vmatprep.subr.bf16.mxu0 %v2583_v2 }
 0xb11   : > { %v1467_v24 = vsel %vm767_vm2, %v1464_v23, 0.0 }
 0xb12   : > { %1468 = vadd.xlane.f32.xlu1 %v1467_v24  ;;  %2124 = vmatpush3.bf16.msra.mxu0 %v2273_v32 }
 0xb13   : > { %2125 = vmatprep.subr.bf16.mxu0 %v2583_v2 }
 0xb16   : > { %2126 = vmatpush3.bf16.msra.mxu0 %v2274_v43 }
 0xb17   : > { %2127 = vmatprep.subr.bf16.mxu0 %v2583_v2 }
 0xb1a   : > { %2128 = vmatpush3.bf16.msra.mxu0 %v2275_v44 }
 0xb9f   : > { %v1469_v25 = vpop.xlane.xlu1 %1468 }
 0xba0   : > { %v1471_v26 = vmul.f32 0.03125, %v1469_v25 }
 0xba2   : > { %v1472_v27 = vsub.f32 %v1464_v23, %v1471_v26 }
 0xba4   : > { %v1473_v28 = vmul.f32 %v1472_v27, %v1472_v27 }
 0xba6   : > { %v1474_v29 = vsel %vm767_vm2, %v1473_v28, 0.0 }
 0xba7   : > { %1475 = vadd.xlane.f32.xlu1 %v1474_v29 }
 0xc34   : > { %v1476_v33 = vpop.xlane.xlu1 %1475 }
 0xc35   : > { %v1477_v34 = vmul.f32 0.03125, %v1476_v33 }
 0xc37   : > { %v1478_v35 = vadd.f32 1e-05, %v1477_v34 }
 0xc39   : > { %2292 = vrsqrt.f32 %v1478_v35 }
 0xc43   : > { %v2293_v36 = vpop.eup %2292 }
 0xc44   : > { %v1480_v38 = vmul.f32 %v2293_v36, %v1472_v27 }
 0xc46   : > { %v1487_v40 = vmul.f32 %v1975_v37, %v1480_v38 }
 0xc48   : > { %v1494_v41 = vadd.f32 %v1976_v39, %v1487_v40 }
 0xc4a   : > { %v1495_v42 = vpack.c.bf16 %v1494_v41, %v1494_v41 }
 0xc4c   : > { %2118 = vmatmul.mubr.msk.bf16.vlgmr.msra.gmra.mrb[28].mxu1 %vm767_vm2, %v1495_v42 }
 0xd1f   : > { %v1556_v46 = vpop.f32.mrb[28].mxu1 }
 0xd20   : > { %v1557_v47 = vadd.f32 %v1977_v45, %v1556_v46  ;;  %v2119_v48 = vpop.f32.mrb[29].mxu1 }
 0xd21   : > { %v1559_v49 = vpop.f32.mrb[30].mxu1 }
 0xd22   : > { %v1562_v50 = vmax.f32 %v1557_v47, 0.0  ;;  %v2120_v51 = vpop.f32.mrb[31].mxu1 }
 0xd24   : > { %v1563_v52 = vpack.c.bf16 %v1562_v50, %v1562_v50 }
 0xd26   : > { %2130 = vmatmul.mubr.msk.bf16.vlgmr.msra.gmra.mrb[24].mxu0 %vm1603_vm6, %v1563_v52 }
 0xdf9   : > { %v1641_v54 = vpop.f32.mrb[24].mxu0 }
 0xdfa   : > { %v1642_v2 = vadd.f32 %v1981_v53, %v1641_v54  ;;  %v2131_v55 = vpop.f32.mrb[25].mxu0 }
 0xdfb   : > { %v1644_v56 = vpop.f32.mrb[26].mxu0 }
 0xdfc   : > { %v2132_v57 = vpop.f32.mrb[27].mxu0  ;;  %v1647_v58 = vadd.f32 %v1642_v2, %v1494_v41 }
 0xdfe   : > { %v1650_v59 = vsel %vm767_vm2, %v1647_v58, 0.0 }
 0xdff   : > { %1651 = vadd.xlane.f32.xlu1 %v1650_v59 }
 0xe8c   : > { %v1652_v19 = vpop.xlane.xlu1 %1651 }
 0xe8d   : > { %v1653_v20 = vmul.f32 0.03125, %v1652_v19 }
 0xe8f   : > { %v1654_v60 = vsub.f32 %v1647_v58, %v1653_v20 }
 0xe91   : > { %v1655_v61 = vmul.f32 %v1654_v60, %v1654_v60 }
 0xe93   : > { %v1656_v11 = vsel %vm767_vm2, %v1655_v61, 0.0 }
 0xe94   : > { %1657 = vadd.xlane.f32.xlu1 %v1656_v11 }
 0xf21   : > { %v1658_v62 = vpop.xlane.xlu1 %1657 }
 0xf22   : > { %v1659_v63 = vmul.f32 0.03125, %v1658_v62 }
 0xf24   : > { %v1660_v0 = vadd.f32 1e-05, %v1659_v63 }
 0xf26   : > { %2294 = vrsqrt.f32 %v1660_v0 }
 0xf30   : > { %v2295_v1 = vpop.eup %2294 }
 0xf31   : > { %v1662_v5 = vmul.f32 %v2295_v1, %v1654_v60  ;;  %1681 = sbr.rel (%p1989_p7) target bundleno = 3896 (0xf38), region = 100 }
 0xf33   : > { %v1669_v7 = vmul.f32 %v1987_v3, %v1662_v5 }
 0xf35   : > { %v1676_v8 = vadd.f32 %v1988_v6, %v1669_v7 }
 0xf37   : > { %1677 = vst.msk [vmem:[#allocation2] sm:$0xff] %vm767_vm2, %v1676_v8  ;;  %1682 = vst.msk [vmem:[%s3050_s12] sm:$0xff] (!%p1989_p7), %vm767_vm2, %v1676_v8 }
 0xf38 PF: > { %s3398_s29 = sld [smem:[#allocation23_spill]]  ;;  %s3399_s7 = sld [smem:[#allocation45_spill]] }
 0xf39   : > { %s1697_s27 = sshll.u32 %s3050_s12, 4  ;;  %s1684_s1 = scalar_lea.sflag [#allocation5], %s2986_s16  ;;  %s1698_s27 = int_to_ptr.vmem [resolvable:$true] %s1697_s27 }
 0xf3a   : > { %s2446_s13 = scalar_lea.vmem %s1698_s27, 128  ;;  %p3400_p13 = scmp.ne.s32.totalorder %s3365_s23, 0 }
 0xf3b   : > { %p2447_p12 = scmp.ne.s32.totalorder %s1698_s27, %s2446_s13  ;;  %s2596_s6 = smov [#allocation12]  }
 0xf3c   : > { %s2450_s20 = sshll.u32 %s2596_s6, 4  ;;  %s2451_s20 = int_to_ptr.vmem [resolvable:$false] %s2450_s20 }
 0xf3d   : > { %p2448_p0 = pnand %p2447_p12, %p3400_p13  ;;  %s2452_s17 = scalar_lea.vmem %s2451_s20, 256 }
 0xf3e   : > { %s1991_s15 = sshll.u32 %s3398_s29, 7  ;;  %p2453_p1 = scmp.lt.s32.totalorder %s1698_s27, %s2451_s20 }
 0xf3f   : > { %s3227_s2 = scalar_lea.hbm %s3399_s7, %s1991_s15  ;;  %p2449_p4 = pneg %p2448_p0 }
 0xf40   : > { %p2454_p3 = scmp.lt.s32.totalorder %s2452_s17, %s2446_s13 }
 0xf42   : > { %p2455_p5 = por %p2454_p3, %p2453_p1 }
 0xf44   : > { %p2456_p10 = pnand %p2455_p5, %p2449_p4 }
 0xf46   : > { %2459 = shalt.err (!%p2456_p10)
}
 0xf47   : > { %s2460_s16 = scalar_lea.hbm %s3227_s2, 128  ;;  %s2464_s14 = scalar_lea.hbm %s3399_s7, 256 }
 0xf48   : > { %p2461_p8 = scmp.ne.s32.totalorder %s3227_s2, %s2460_s16  ;;  %p2465_p2 = scmp.lt.u32.totalorder %s3227_s2, %s3399_s7 }
 0xf49   : > { %p2466_p6 = scmp.lt.u32.totalorder %s2464_s14, %s2460_s16  ;;  %p2468_p12 = scmp.lt.u32.totalorder %s2460_s16, %s3227_s2 }
 0xf4a   : > { %p2462_p11 = pnand %p2461_p8, %p3400_p13 }
 0xf4b   : > { %p2467_p7 = por %p2466_p6, %p2465_p2 }
 0xf4c   : > { %p2463_p9 = pneg %p2462_p11 }
 0xf4d   : > { %p2469_p0 = por %p2468_p12, %p2467_p7 }
 0xf4f   : > { %p2470_p4 = pnand %p2469_p0, %p2463_p9 }
 0xf51   : > { %2473 = shalt.err (!%p2470_p4)
}
 0xf52   : > { %2143 = dma.vmem_to_hbm [thread:$0]  (%p3400_p13), %s1698_s27, 128, %s3227_s2, %s1684_s1  }
 0xf53 PF: > { %s3401_s11 = sld [smem:[#allocation19_spill]]  ;;  %s3402_s3 = sld [smem:[#allocation31_spill]] }
 0xf54   : > { %p2166_p1 = scmp.ge.s32.totalorder %s2576_s18, 2 }
 0xf59   : > { %s1709_s21 = sand.u32 1, %s3401_s11   ;;  %p3403_p3 = scmp.ne.s32.totalorder %s3402_s3, 0 }
 0xf5a   : > { %s1710_s5 = scalar_lea.sflag [#allocation5], %s1709_s21 }
 0xf5b   : > { %p2162_p5 = pnand %p2166_p1, %p3403_p3 }
 0xf5d   : > { %2531 = dma.done.wait (!%p2162_p5), %s1710_s5, 128  }
 0xf5e   : > { %2533 = vsyncadd (!%p2162_p5), %s1710_s5, 4294967168  ;;  %s35_s18 = sadd.s32 1, %s2576_s18   ;;  %s3404_s25 = sld [smem:[#allocation17_spill]] }
 0xf5f   : > { %p32_p10 = scmp.ge.s32.totalorder %s35_s18, 6   ;;  %s3405_s26 = sld [smem:[#allocation18_spill]] }
 0xf60   : > { %s3406_s27 = sld [smem:[#allocation27_spill]]  ;;  %s3407_s28 = sld [smem:[#allocation20_spill]] }
 0xf61   : > { %s3408_s29 = sld [smem:[#allocation21_spill]]  ;;  %s3409_s30 = sld [smem:[#allocation30_spill]] }
 0xf62   : > { %s3410_s14 = sld [smem:[#allocation24_spill]]  ;;  %s3411_s15 = sld [smem:[#allocation25_spill]] }
 0xf63   : > { %s3412_s16 = sld [smem:[#allocation26_spill]]  ;;  %s3413_s17 = sld [smem:[#allocation28_spill]] }
 0xf64   :  { %34 = sbr.rel (!%p32_p10) target bundleno = 28 (0x1c), region = 197 }
 0xf6b   :  { %1715 = vsyncpa [#allocation4], 1 }
 0xf6c   :  { %1717 = vsyncpa [#allocation4 + $0x1], 1 }
 0xf6d   :  { %1718 = vsyncpa [#allocation7], 1 }
 0xf6e   :  { %1720 = vsyncpa [#allocation7 + $0x1], 1 }
 0xf6f   :  { %1721 = vsyncpa [#allocation10], 1 }
 0xf70   :  { %1723 = vsyncpa [#allocation10 + $0x1], 1 }
 0xf71   :  { %1724 = vsyncpa [#allocation5], 1 }
 0xf72   :  { %1726 = vsyncpa [#allocation5 + $0x1], 1 }

</bundles_post_ra>
